<compile_context>
chip_gen: v7x
topology: tpu7x:2x2x1
jax: 0.10.0
libtpu: 0.0.40
codegen_flags: <defaults>
</compile_context>

<pallas_src>
import math

import jax
import jax.numpy as jnp
import numpy as np
from jax.experimental import pallas as pl
from jax.experimental.pallas import tpu as pltpu

# ----------------------------- config (small) --------------------------------
BATCH = 2
SEQ = 8
NUM_HEADS = 2
HEAD_DIM = 128                     # real-Llama head size -> lane-aligned heads
HIDDEN = NUM_HEADS * HEAD_DIM      # 256: multiple of 128 -> lane-dense stores
INTERMEDIATE = 512
MAX_POS = 64
ROPE_BASE = 10000.0
RMS_EPS = 1e-6

COMPUTE_DTYPE = jnp.bfloat16       # MXU operand dtype; accumulation stays f32
NEG_MASK = -1e30                   # finite mask sentinel (safer than f32 min)


# -------------------------------- kernel -------------------------------------
def decoder_layer_kernel(x_ref, cos_ref, sin_ref,
                         wq_ref, wk_ref, wv_ref, wo_ref,
                         wg_ref, wu_ref, wd_ref,
                         ln1_ref, ln2_ref,
                         o_ref):
    # One grid step == one batch element: x_ref is that batch's [S, H] slab.
    x = x_ref[...].astype(jnp.float32)                       # [S, H]

    # ---- input RMSNorm (f32, VPU) ----
    var = jnp.mean(x * x, axis=-1, keepdims=True)
    h = ln1_ref[...] * (x * jax.lax.rsqrt(var + RMS_EPS))    # [S, H]

    # ---- QKV projections: bf16 operands, f32 accumulation (MXU) ----
    hc = h.astype(COMPUTE_DTYPE)
    q = jnp.dot(hc, wq_ref[...], preferred_element_type=jnp.float32)
    k = jnp.dot(hc, wk_ref[...], preferred_element_type=jnp.float32)
    v = jnp.dot(hc, wv_ref[...], preferred_element_type=jnp.float32)

    # fold the softmax 1/sqrt(D) scale into q (RoPE is linear, so order is OK)
    q = q * (1.0 / math.sqrt(HEAD_DIM))

    cos = cos_ref[...]                                       # [S, D] f32
    sin = sin_ref[...]                                       # [S, D] f32; the
    # rotate_half sign is already folded into this table host-side.

    # ---- RoPE + head split.  HEAD_DIM == 128, so each head is a vreg-aligned
    #      128-lane slice; rotate_half == roll by D/2 (XLU) * sign-folded sin.
    def rope(t):                                             # t: [S, D] f32
        return t * cos + pltpu.roll(t, HEAD_DIM // 2, axis=1) * sin

    q_heads, k_heads, v_heads = [], [], []
    for hh in range(NUM_HEADS):
        lo = hh * HEAD_DIM
        hi = lo + HEAD_DIM
        q_heads.append(rope(q[:, lo:hi]).astype(COMPUTE_DTYPE))
        k_heads.append(rope(k[:, lo:hi]).astype(COMPUTE_DTYPE))
        v_heads.append(v[:, lo:hi].astype(COMPUTE_DTYPE))
    q3 = jnp.stack(q_heads, axis=0)                          # [NH, S, D]
    k3 = jnp.stack(k_heads, axis=0)
    v3 = jnp.stack(v_heads, axis=0)

    # ---- attention: one leading-batch einsum over all heads ----
    s = jnp.einsum("hqd,hkd->hqk", q3, k3,
                   preferred_element_type=jnp.float32)       # [NH, S, S]

    # causal mask generated in-kernel (no [B,1,S,S] DMA)
    q_idx = jax.lax.broadcasted_iota(jnp.int32, (SEQ, SEQ), 0)
    k_idx = jax.lax.broadcasted_iota(jnp.int32, (SEQ, SEQ), 1)
    s = jnp.where((q_idx >= k_idx)[None], s, NEG_MASK)

    m = jnp.max(s, axis=-1, keepdims=True)
    p = jnp.exp(s - m)
    denom = jnp.sum(p, axis=-1, keepdims=True)
    p = p * pl.reciprocal(denom, approx=True)                # EUP slot

    o3 = jnp.einsum("hqk,hkd->hqd", p.astype(COMPUTE_DTYPE), v3,
                    preferred_element_type=jnp.float32)      # [NH, S, D]

    # Re-assemble the [S, H] context (128-aligned lane concat) and run o_proj
    # as ONE full-depth (K = H) bf16 matmul with the un-replicated weight.
    ctx = jnp.concatenate([o3[hh] for hh in range(NUM_HEADS)], axis=-1)
    attn = jnp.dot(ctx.astype(COMPUTE_DTYPE), wo_ref[...],
                   preferred_element_type=jnp.float32)       # [S, H]

    # ---- residual ----
    h1 = x + attn

    # ---- post-attention RMSNorm + SwiGLU MLP ----
    var2 = jnp.mean(h1 * h1, axis=-1, keepdims=True)
    n2 = ln2_ref[...] * (h1 * jax.lax.rsqrt(var2 + RMS_EPS))
    nc = n2.astype(COMPUTE_DTYPE)
    g = jnp.dot(nc, wg_ref[...], preferred_element_type=jnp.float32)
    u = jnp.dot(nc, wu_ref[...], preferred_element_type=jnp.float32)
    act = (g * jax.nn.sigmoid(g)) * u                        # SiLU(gate)*up, f32
    d = jnp.dot(act.astype(COMPUTE_DTYPE), wd_ref[...],
                preferred_element_type=jnp.float32)

    # lane-dense store: last dim is a multiple of 128
    o_ref[...] = (h1 + d).astype(o_ref.dtype)                # [S, H]


# -------------------------------- wrapper -------------------------------------
@jax.jit
def llama_decoder_layer(x, cos_sd, sin_sd, params):
    """x: [B, S, H] f32; cos_sd/sin_sd: [S, HEAD_DIM] RoPE tables at arange(S)."""
    B, S, H = x.shape
    assert (B, S, H) == (BATCH, SEQ, HIDDEN)
    x2 = x.reshape(B * S, H)

    # Fold the rotate_half sign into sin (cheap XLA glue):
    #   rotate_half(t) == roll(t, D/2, axis=-1) * sign,  sign = [-1]*D/2 ++ [+1]*D/2
    sign = jnp.concatenate([-jnp.ones((HEAD_DIM // 2,), jnp.float32),
                            jnp.ones((HEAD_DIM // 2,), jnp.float32)])
    sin_signed = sin_sd * sign[None, :]

    cd = COMPUTE_DTYPE
    wq = params["wq"].astype(cd)
    wk = params["wk"].astype(cd)
    wv = params["wv"].astype(cd)
    wo = params["wo"].astype(cd)
    wg = params["wg"].astype(cd)
    wu = params["wu"].astype(cd)
    wd = params["wd"].astype(cd)

    # Weights / RoPE tables / norm gains: whole-array VMEM residents (no block
    # pipelining, single buffer, shared by every grid step).
    def vmem():
        return pl.BlockSpec(memory_space=pltpu.MemorySpace.VMEM)

    grid_spec = pltpu.PrefetchScalarGridSpec(
        num_scalar_prefetch=0,
        grid=(B,),                                           # one step per batch
        in_specs=[
            pl.BlockSpec((SEQ, HIDDEN), lambda b: (b, 0)),   # x   [S, H] slab
            vmem(),                                          # cos [S, D]
            vmem(),                                          # sin [S, D] (signed)
            vmem(), vmem(), vmem(), vmem(),                  # wq wk wv wo
            vmem(), vmem(), vmem(),                          # wg wu wd
            vmem(), vmem(),                                  # ln1 ln2
        ],
        out_specs=pl.BlockSpec((SEQ, HIDDEN), lambda b: (b, 0)),
    )

    out2 = pl.pallas_call(
        decoder_layer_kernel,
        out_shape=jax.ShapeDtypeStruct((B * S, H), x.dtype),
        grid_spec=grid_spec,
        compiler_params=pltpu.CompilerParams(
            dimension_semantics=("parallel",)),              # feeds both v7x TCs
    )(x2, cos_sd, sin_signed, wq, wk, wv, wo, wg, wu, wd,
      params["ln1"], params["ln2"])
    return out2.reshape(B, S, H)


# --------------------------- pure-JAX reference --------------------------------
def reference_layer(x, cos_sd, sin_sd, params):
    """Module-faithful reference, using the same bf16-operand / f32-accum matmuls."""
    cd = COMPUTE_DTYPE
    B, S, H = x.shape

    def rmsnorm(h, w):
        hf = h.astype(jnp.float32)
        var = jnp.mean(hf * hf, axis=-1, keepdims=True)
        return w * (hf * jax.lax.rsqrt(var + RMS_EPS))

    def proj(a, w):
        return jnp.einsum("bsc,cd->bsd", a.astype(cd), w.astype(cd),
                          preferred_element_type=jnp.float32)

    residual = x.astype(jnp.float32)
    h = rmsnorm(x, params["ln1"][0])
    q = proj(h, params["wq"])
    k = proj(h, params["wk"])
    v = proj(h, params["wv"])
    q = q.reshape(B, S, NUM_HEADS, HEAD_DIM).transpose(0, 2, 1, 3)
    k = k.reshape(B, S, NUM_HEADS, HEAD_DIM).transpose(0, 2, 1, 3)
    v = v.reshape(B, S, NUM_HEADS, HEAD_DIM).transpose(0, 2, 1, 3)

    cos = cos_sd[None, None]
    sin = sin_sd[None, None]

    def rotate_half(t):
        half = HEAD_DIM // 2
        return jnp.concatenate([-t[..., half:], t[..., :half]], axis=-1)

    q = q * cos + rotate_half(q) * sin
    k = k * cos + rotate_half(k) * sin

    neg = jnp.finfo(jnp.float32).min
    causal = jnp.tril(jnp.ones((S, S), dtype=bool))
    mask = jnp.where(causal, 0.0, neg)[None, None]            # additive [1,1,S,S]

    aw = jnp.einsum("bhqd,bhkd->bhqk", q.astype(cd), k.astype(cd),
                    preferred_element_type=jnp.float32) / math.sqrt(HEAD_DIM)
    aw = aw + mask
    aw = jax.nn.softmax(aw, axis=-1)
    attn = jnp.einsum("bhqk,bhkd->bhqd", aw.astype(cd), v.astype(cd),
                      preferred_element_type=jnp.float32)
    attn = attn.transpose(0, 2, 1, 3).reshape(B, S, H)
    attn = proj(attn, params["wo"])

    h1 = residual + attn
    n2 = rmsnorm(h1, params["ln2"][0])
    g = proj(n2, params["wg"])
    u = proj(n2, params["wu"])
    act = jax.nn.silu(g) * u
    return h1 + proj(act, params["wd"])


# ---------------------------------- main ---------------------------------------
if __name__ == "__main__":
    key = jax.random.PRNGKey(0)
    ks = jax.random.split(key, 10)

    x = jax.random.normal(ks[0], (BATCH, SEQ, HIDDEN), dtype=jnp.float32)

    scale = 0.05
    params = {
        "wq": scale * jax.random.normal(ks[1], (HIDDEN, HIDDEN), jnp.float32),
        "wk": scale * jax.random.normal(ks[2], (HIDDEN, HIDDEN), jnp.float32),
        "wv": scale * jax.random.normal(ks[3], (HIDDEN, HIDDEN), jnp.float32),
        "wo": scale * jax.random.normal(ks[4], (HIDDEN, HIDDEN), jnp.float32),
        "wg": scale * jax.random.normal(ks[5], (HIDDEN, INTERMEDIATE), jnp.float32),
        "wu": scale * jax.random.normal(ks[6], (HIDDEN, INTERMEDIATE), jnp.float32),
        "wd": scale * jax.random.normal(ks[7], (INTERMEDIATE, HIDDEN), jnp.float32),
        "ln1": 1.0 + 0.1 * jax.random.normal(ks[8], (1, HIDDEN), jnp.float32),
        "ln2": 1.0 + 0.1 * jax.random.normal(ks[9], (1, HIDDEN), jnp.float32),
    }

    # RoPE cos/sin cache gathered at position_ids = arange(S)  (host-side glue)
    inv_freq = 1.0 / (ROPE_BASE ** (np.arange(0, HEAD_DIM, 2, dtype=np.float32)
                                    / HEAD_DIM))
    t = np.arange(MAX_POS, dtype=np.float32)
    freqs = np.einsum("i,j->ij", t, inv_freq)
    emb = np.concatenate([freqs, freqs], axis=-1)             # [MAX_POS, D]
    pos = np.arange(SEQ)
    cos_sd = jnp.asarray(np.cos(emb)[pos], dtype=jnp.float32)    # [S, D]
    sin_sd = jnp.asarray(np.sin(emb)[pos], dtype=jnp.float32)

    out = jax.block_until_ready(llama_decoder_layer(x, cos_sd, sin_sd, params))
    ref = jax.block_until_ready(reference_layer(x, cos_sd, sin_sd, params))

    # Tolerance covers bf16 MXU operands, approx-reciprocal softmax and f32
    # accumulation-order differences; real bugs (RoPE/mask/head order) would
    # show O(0.1 - 1) errors.
    np.testing.assert_allclose(np.asarray(out), np.asarray(ref),
                               atol=1e-2, rtol=1e-2)

    print("KERNEL_OK")
</pallas_src>

<mosaic_0001>
module attributes {stable_mosaic.version = 11 : i64} {
  func.func @decoder_layer_kernel(%arg0: i32, %arg1: memref<8x256xf32, #tpu.memory_space<vmem>>, %arg2: memref<8x128xf32, #tpu.memory_space<vmem>>, %arg3: memref<8x128xf32, #tpu.memory_space<vmem>>, %arg4: memref<256x256xbf16, #tpu.memory_space<vmem>>, %arg5: memref<256x256xbf16, #tpu.memory_space<vmem>>, %arg6: memref<256x256xbf16, #tpu.memory_space<vmem>>, %arg7: memref<256x256xbf16, #tpu.memory_space<vmem>>, %arg8: memref<256x512xbf16, #tpu.memory_space<vmem>>, %arg9: memref<256x512xbf16, #tpu.memory_space<vmem>>, %arg10: memref<512x256xbf16, #tpu.memory_space<vmem>>, %arg11: memref<1x256xf32, #tpu.memory_space<vmem>>, %arg12: memref<1x256xf32, #tpu.memory_space<vmem>>, %arg13: memref<8x256xf32, #tpu.memory_space<vmem>>) attributes {dimension_semantics = [#tpu.dimension_semantics<parallel>], iteration_bounds = array<i64: 2>, scalar_prefetch = 0 : i64, scratch_operands = 0 : i64, tpu.core_type = #tpu.core_type<tc>, window_params = [{transform_indices = @transform_0, window_bounds = array<i64: 8, 256>}, {pipeline_mode = #tpu.pipeline_mode<synchronous>, transform_indices = @transform_1, window_bounds = array<i64: 8, 128>}, {pipeline_mode = #tpu.pipeline_mode<synchronous>, transform_indices = @transform_2, window_bounds = array<i64: 8, 128>}, {pipeline_mode = #tpu.pipeline_mode<synchronous>, transform_indices = @transform_3, window_bounds = array<i64: 256, 256>}, {pipeline_mode = #tpu.pipeline_mode<synchronous>, transform_indices = @transform_4, window_bounds = array<i64: 256, 256>}, {pipeline_mode = #tpu.pipeline_mode<synchronous>, transform_indices = @transform_5, window_bounds = array<i64: 256, 256>}, {pipeline_mode = #tpu.pipeline_mode<synchronous>, transform_indices = @transform_6, window_bounds = array<i64: 256, 256>}, {pipeline_mode = #tpu.pipeline_mode<synchronous>, transform_indices = @transform_7, window_bounds = array<i64: 256, 512>}, {pipeline_mode = #tpu.pipeline_mode<synchronous>, transform_indices = @transform_8, window_bounds = array<i64: 256, 512>}, {pipeline_mode = #tpu.pipeline_mode<synchronous>, transform_indices = @transform_9, window_bounds = array<i64: 512, 256>}, {pipeline_mode = #tpu.pipeline_mode<synchronous>, transform_indices = @transform_10, window_bounds = array<i64: 1, 256>}, {pipeline_mode = #tpu.pipeline_mode<synchronous>, transform_indices = @transform_11, window_bounds = array<i64: 1, 256>}, {transform_indices = @transform_12, window_bounds = array<i64: 8, 256>}]} {
    %c0 = arith.constant 0 : index
    %c0_0 = arith.constant 0 : index
    %0 = vector.load %arg1[%c0, %c0_0] : memref<8x256xf32, #tpu.memory_space<vmem>>, vector<8x256xf32>
    %1 = arith.mulf %0, %0 : vector<8x256xf32>
    %cst = arith.constant dense<0.000000e+00> : vector<8xf32>
    %2 = vector.multi_reduction <add>, %1, %cst [1] : vector<8x256xf32> to vector<8xf32>
    %3 = vector.shape_cast %2 : vector<8xf32> to vector<8x1xf32>
    %cst_1 = arith.constant 2.560000e+02 : f32
    %4 = vector.broadcast %cst_1 : f32 to vector<8x1xf32>
    %5 = arith.divf %3, %4 : vector<8x1xf32>
    %c0_2 = arith.constant 0 : index
    %c0_3 = arith.constant 0 : index
    %6 = vector.load %arg11[%c0_2, %c0_3] : memref<1x256xf32, #tpu.memory_space<vmem>>, vector<1x256xf32>
    %cst_4 = arith.constant 9.99999997E-7 : f32
    %7 = vector.broadcast %cst_4 : f32 to vector<8x1xf32>
    %8 = arith.addf %5, %7 : vector<8x1xf32>
    %9 = math.rsqrt %8 : vector<8x1xf32>
    %10 = vector.broadcast %9 : vector<8x1xf32> to vector<8x256xf32>
    %11 = arith.mulf %0, %10 : vector<8x256xf32>
    %12 = vector.broadcast %6 : vector<1x256xf32> to vector<8x256xf32>
    %13 = arith.mulf %12, %11 : vector<8x256xf32>
    %14 = arith.truncf %13 : vector<8x256xf32> to vector<8x256xbf16>
    %c0_5 = arith.constant 0 : index
    %c0_6 = arith.constant 0 : index
    %15 = vector.load %arg4[%c0_5, %c0_6] : memref<256x256xbf16, #tpu.memory_space<vmem>>, vector<256x256xbf16>
    %cst_7 = arith.constant dense<0.000000e+00> : vector<8x256xf32>
    %16 = tpu.matmul %14, %15, %cst_7 {dimension_numbers = #tpu.dot_dimension_numbers<[1], [0], [0], [1], [0, 0, 1, 1], [], []>} : vector<8x256xbf16>, vector<256x256xbf16>, vector<8x256xf32> -> vector<8x256xf32>
    %c0_8 = arith.constant 0 : index
    %c0_9 = arith.constant 0 : index
    %17 = vector.load %arg5[%c0_8, %c0_9] : memref<256x256xbf16, #tpu.memory_space<vmem>>, vector<256x256xbf16>
    %cst_10 = arith.constant dense<0.000000e+00> : vector<8x256xf32>
    %18 = tpu.matmul %14, %17, %cst_10 {dimension_numbers = #tpu.dot_dimension_numbers<[1], [0], [0], [1], [0, 0, 1, 1], [], []>} : vector<8x256xbf16>, vector<256x256xbf16>, vector<8x256xf32> -> vector<8x256xf32>
    %c0_11 = arith.constant 0 : index
    %c0_12 = arith.constant 0 : index
    %19 = vector.load %arg6[%c0_11, %c0_12] : memref<256x256xbf16, #tpu.memory_space<vmem>>, vector<256x256xbf16>
    %cst_13 = arith.constant dense<0.000000e+00> : vector<8x256xf32>
    %20 = tpu.matmul %14, %19, %cst_13 {dimension_numbers = #tpu.dot_dimension_numbers<[1], [0], [0], [1], [0, 0, 1, 1], [], []>} : vector<8x256xbf16>, vector<256x256xbf16>, vector<8x256xf32> -> vector<8x256xf32>
    %cst_14 = arith.constant 0.0883883461 : f32
    %21 = vector.broadcast %cst_14 : f32 to vector<8x256xf32>
    %22 = arith.mulf %16, %21 : vector<8x256xf32>
    %c0_15 = arith.constant 0 : index
    %c0_16 = arith.constant 0 : index
    %23 = vector.load %arg2[%c0_15, %c0_16] : memref<8x128xf32, #tpu.memory_space<vmem>>, vector<8x128xf32>
    %c0_17 = arith.constant 0 : index
    %c0_18 = arith.constant 0 : index
    %24 = vector.load %arg3[%c0_17, %c0_18] : memref<8x128xf32, #tpu.memory_space<vmem>>, vector<8x128xf32>
    %25 = vector.extract_strided_slice %22 {offsets = [0, 0], sizes = [8, 128], strides = [1, 1]} : vector<8x256xf32> to vector<8x128xf32>
    %26 = arith.mulf %25, %23 : vector<8x128xf32>
    %c64_i32 = arith.constant 64 : i32
    %27 = tpu.dynamic_rotate %25 by %c64_i32 dim 1 : vector<8x128xf32>, i32 -> vector<8x128xf32>
    %28 = arith.mulf %27, %24 : vector<8x128xf32>
    %29 = arith.addf %26, %28 : vector<8x128xf32>
    %30 = arith.truncf %29 : vector<8x128xf32> to vector<8x128xbf16>
    %31 = vector.extract_strided_slice %18 {offsets = [0, 0], sizes = [8, 128], strides = [1, 1]} : vector<8x256xf32> to vector<8x128xf32>
    %32 = arith.mulf %31, %23 : vector<8x128xf32>
    %c64_i32_19 = arith.constant 64 : i32
    %33 = tpu.dynamic_rotate %31 by %c64_i32_19 dim 1 : vector<8x128xf32>, i32 -> vector<8x128xf32>
    %34 = arith.mulf %33, %24 : vector<8x128xf32>
    %35 = arith.addf %32, %34 : vector<8x128xf32>
    %36 = arith.truncf %35 : vector<8x128xf32> to vector<8x128xbf16>
    %37 = vector.extract_strided_slice %20 {offsets = [0, 0], sizes = [8, 128], strides = [1, 1]} : vector<8x256xf32> to vector<8x128xf32>
    %38 = arith.truncf %37 : vector<8x128xf32> to vector<8x128xbf16>
    %39 = vector.extract_strided_slice %22 {offsets = [0, 128], sizes = [8, 128], strides = [1, 1]} : vector<8x256xf32> to vector<8x128xf32>
    %40 = arith.mulf %39, %23 : vector<8x128xf32>
    %c64_i32_20 = arith.constant 64 : i32
    %41 = tpu.dynamic_rotate %39 by %c64_i32_20 dim 1 : vector<8x128xf32>, i32 -> vector<8x128xf32>
    %42 = arith.mulf %41, %24 : vector<8x128xf32>
    %43 = arith.addf %40, %42 : vector<8x128xf32>
    %44 = arith.truncf %43 : vector<8x128xf32> to vector<8x128xbf16>
    %45 = vector.extract_strided_slice %18 {offsets = [0, 128], sizes = [8, 128], strides = [1, 1]} : vector<8x256xf32> to vector<8x128xf32>
    %46 = arith.mulf %45, %23 : vector<8x128xf32>
    %c64_i32_21 = arith.constant 64 : i32
    %47 = tpu.dynamic_rotate %45 by %c64_i32_21 dim 1 : vector<8x128xf32>, i32 -> vector<8x128xf32>
    %48 = arith.mulf %47, %24 : vector<8x128xf32>
    %49 = arith.addf %46, %48 : vector<8x128xf32>
    %50 = arith.truncf %49 : vector<8x128xf32> to vector<8x128xbf16>
    %51 = vector.extract_strided_slice %20 {offsets = [0, 128], sizes = [8, 128], strides = [1, 1]} : vector<8x256xf32> to vector<8x128xf32>
    %52 = arith.truncf %51 : vector<8x128xf32> to vector<8x128xbf16>
    %53 = vector.shape_cast %30 : vector<8x128xbf16> to vector<1x8x128xbf16>
    %54 = vector.shape_cast %44 : vector<8x128xbf16> to vector<1x8x128xbf16>
    %55 = tpu.concatenate %53, %54 in 0 : vector<1x8x128xbf16>, vector<1x8x128xbf16> -> vector<2x8x128xbf16>
    %56 = vector.shape_cast %36 : vector<8x128xbf16> to vector<1x8x128xbf16>
    %57 = vector.shape_cast %50 : vector<8x128xbf16> to vector<1x8x128xbf16>
    %58 = tpu.concatenate %56, %57 in 0 : vector<1x8x128xbf16>, vector<1x8x128xbf16> -> vector<2x8x128xbf16>
    %59 = vector.shape_cast %38 : vector<8x128xbf16> to vector<1x8x128xbf16>
    %60 = vector.shape_cast %52 : vector<8x128xbf16> to vector<1x8x128xbf16>
    %61 = tpu.concatenate %59, %60 in 0 : vector<1x8x128xbf16>, vector<1x8x128xbf16> -> vector<2x8x128xbf16>
    "tpu.trace_start"() <{level = 10 : i32, message = "hqd,hkd->hqk"}> : () -> ()
    %cst_22 = arith.constant dense<0.000000e+00> : vector<2x8x8xf32>
    %62 = tpu.matmul %55, %58, %cst_22 {dimension_numbers = #tpu.dot_dimension_numbers<[2], [2], [1], [1], [0, 0, 0, 1, 1, 1], [0], [0]>} : vector<2x8x128xbf16>, vector<2x8x128xbf16>, vector<2x8x8xf32> -> vector<2x8x8xf32>
    "tpu.trace_stop"() : () -> ()
    %63 = tpu.iota {dimensions = array<i32: 0>} : vector<8x8xi32>
    %64 = tpu.iota {dimensions = array<i32: 1>} : vector<8x8xi32>
    %65 = arith.cmpi sge, %63, %64 : vector<8x8xi32>
    %66 = vector.shape_cast %65 : vector<8x8xi1> to vector<1x8x8xi1>
    %cst_23 = arith.constant -1.000000e+30 : f32
    %67 = vector.shape_cast %66 : vector<1x8x8xi1> to vector<1x8x8xi1>
    %68 = vector.broadcast %67 : vector<1x8x8xi1> to vector<2x8x8xi1>
    %69 = vector.broadcast %cst_23 : f32 to vector<2x8x8xf32>
    %70 = arith.select %68, %62, %69 : vector<2x8x8xi1>, vector<2x8x8xf32>
    %cst_24 = arith.constant dense<0xFF800000> : vector<2x8xf32>
    %71 = vector.multi_reduction <maximumf>, %70, %cst_24 [2] : vector<2x8x8xf32> to vector<2x8xf32>
    %72 = vector.shape_cast %71 : vector<2x8xf32> to vector<2x8x1xf32>
    %73 = vector.broadcast %72 : vector<2x8x1xf32> to vector<2x8x8xf32>
    %74 = arith.subf %70, %73 : vector<2x8x8xf32>
    %75 = math.exp %74 : vector<2x8x8xf32>
    %cst_25 = arith.constant dense<0.000000e+00> : vector<2x8xf32>
    %76 = vector.multi_reduction <add>, %75, %cst_25 [2] : vector<2x8x8xf32> to vector<2x8xf32>
    %77 = vector.shape_cast %76 : vector<2x8xf32> to vector<2x8x1xf32>
    %78 = tpu.reciprocal %77 {approx = true} : vector<2x8x1xf32> -> vector<2x8x1xf32>
    %79 = vector.broadcast %78 : vector<2x8x1xf32> to vector<2x8x8xf32>
    %80 = arith.mulf %75, %79 : vector<2x8x8xf32>
    %81 = arith.truncf %80 : vector<2x8x8xf32> to vector<2x8x8xbf16>
    "tpu.trace_start"() <{level = 10 : i32, message = "hqk,hkd->hqd"}> : () -> ()
    %cst_26 = arith.constant dense<0.000000e+00> : vector<2x8x128xf32>
    %82 = tpu.matmul %81, %61, %cst_26 {dimension_numbers = #tpu.dot_dimension_numbers<[2], [1], [1], [2], [0, 0, 0, 1, 1, 2], [0], [0]>} : vector<2x8x8xbf16>, vector<2x8x128xbf16>, vector<2x8x128xf32> -> vector<2x8x128xf32>
    "tpu.trace_stop"() : () -> ()
    %83 = vector.extract_strided_slice %82 {offsets = [0, 0, 0], sizes = [1, 8, 128], strides = [1, 1, 1]} : vector<2x8x128xf32> to vector<1x8x128xf32>
    %84 = vector.shape_cast %83 : vector<1x8x128xf32> to vector<8x128xf32>
    %85 = vector.extract_strided_slice %82 {offsets = [1, 0, 0], sizes = [1, 8, 128], strides = [1, 1, 1]} : vector<2x8x128xf32> to vector<1x8x128xf32>
    %86 = vector.shape_cast %85 : vector<1x8x128xf32> to vector<8x128xf32>
    %87 = tpu.concatenate %84, %86 in 1 : vector<8x128xf32>, vector<8x128xf32> -> vector<8x256xf32>
    %88 = arith.truncf %87 : vector<8x256xf32> to vector<8x256xbf16>
    %c0_27 = arith.constant 0 : index
    %c0_28 = arith.constant 0 : index
    %89 = vector.load %arg7[%c0_27, %c0_28] : memref<256x256xbf16, #tpu.memory_space<vmem>>, vector<256x256xbf16>
    %cst_29 = arith.constant dense<0.000000e+00> : vector<8x256xf32>
    %90 = tpu.matmul %88, %89, %cst_29 {dimension_numbers = #tpu.dot_dimension_numbers<[1], [0], [0], [1], [0, 0, 1, 1], [], []>} : vector<8x256xbf16>, vector<256x256xbf16>, vector<8x256xf32> -> vector<8x256xf32>
    %91 = arith.addf %0, %90 : vector<8x256xf32>
    %92 = arith.mulf %91, %91 : vector<8x256xf32>
    %cst_30 = arith.constant dense<0.000000e+00> : vector<8xf32>
    %93 = vector.multi_reduction <add>, %92, %cst_30 [1] : vector<8x256xf32> to vector<8xf32>
    %94 = vector.shape_cast %93 : vector<8xf32> to vector<8x1xf32>
    %cst_31 = arith.constant 2.560000e+02 : f32
    %95 = vector.broadcast %cst_31 : f32 to vector<8x1xf32>
    %96 = arith.divf %94, %95 : vector<8x1xf32>
    %c0_32 = arith.constant 0 : index
    %c0_33 = arith.constant 0 : index
    %97 = vector.load %arg12[%c0_32, %c0_33] : memref<1x256xf32, #tpu.memory_space<vmem>>, vector<1x256xf32>
    %cst_34 = arith.constant 9.99999997E-7 : f32
    %98 = vector.broadcast %cst_34 : f32 to vector<8x1xf32>
    %99 = arith.addf %96, %98 : vector<8x1xf32>
    %100 = math.rsqrt %99 : vector<8x1xf32>
    %101 = vector.broadcast %100 : vector<8x1xf32> to vector<8x256xf32>
    %102 = arith.mulf %91, %101 : vector<8x256xf32>
    %103 = vector.broadcast %97 : vector<1x256xf32> to vector<8x256xf32>
    %104 = arith.mulf %103, %102 : vector<8x256xf32>
    %105 = arith.truncf %104 : vector<8x256xf32> to vector<8x256xbf16>
    %c0_35 = arith.constant 0 : index
    %c0_36 = arith.constant 0 : index
    %106 = vector.load %arg8[%c0_35, %c0_36] : memref<256x512xbf16, #tpu.memory_space<vmem>>, vector<256x512xbf16>
    %cst_37 = arith.constant dense<0.000000e+00> : vector<8x512xf32>
    %107 = tpu.matmul %105, %106, %cst_37 {dimension_numbers = #tpu.dot_dimension_numbers<[1], [0], [0], [1], [0, 0, 1, 1], [], []>} : vector<8x256xbf16>, vector<256x512xbf16>, vector<8x512xf32> -> vector<8x512xf32>
    %c0_38 = arith.constant 0 : index
    %c0_39 = arith.constant 0 : index
    %108 = vector.load %arg9[%c0_38, %c0_39] : memref<256x512xbf16, #tpu.memory_space<vmem>>, vector<256x512xbf16>
    %cst_40 = arith.constant dense<0.000000e+00> : vector<8x512xf32>
    %109 = tpu.matmul %105, %108, %cst_40 {dimension_numbers = #tpu.dot_dimension_numbers<[1], [0], [0], [1], [0, 0, 1, 1], [], []>} : vector<8x256xbf16>, vector<256x512xbf16>, vector<8x512xf32> -> vector<8x512xf32>
    %110 = arith.negf %107 : vector<8x512xf32>
    %111 = math.exp %110 : vector<8x512xf32>
    %cst_41 = arith.constant 1.000000e+00 : f32
    %112 = vector.broadcast %cst_41 : f32 to vector<8x512xf32>
    %113 = arith.addf %112, %111 : vector<8x512xf32>
    %114 = arith.divf %112, %113 : vector<8x512xf32>
    %115 = arith.mulf %107, %114 : vector<8x512xf32>
    %116 = arith.mulf %115, %109 : vector<8x512xf32>
    %117 = arith.truncf %116 : vector<8x512xf32> to vector<8x512xbf16>
    %c0_42 = arith.constant 0 : index
    %c0_43 = arith.constant 0 : index
    %118 = vector.load %arg10[%c0_42, %c0_43] : memref<512x256xbf16, #tpu.memory_space<vmem>>, vector<512x256xbf16>
    %cst_44 = arith.constant dense<0.000000e+00> : vector<8x256xf32>
    %119 = tpu.matmul %117, %118, %cst_44 {dimension_numbers = #tpu.dot_dimension_numbers<[1], [0], [0], [1], [0, 0, 1, 1], [], []>} : vector<8x512xbf16>, vector<512x256xbf16>, vector<8x256xf32> -> vector<8x256xf32>
    %120 = arith.addf %91, %119 : vector<8x256xf32>
    %c0_45 = arith.constant 0 : index
    %c0_46 = arith.constant 0 : index
    %121 = vector.load %arg13[%c0_45, %c0_46] : memref<8x256xf32, #tpu.memory_space<vmem>>, vector<8x256xf32>
    tpu.vector_store %arg13[%c0_45, %c0_46], %120 {strides = array<i32>} : memref<8x256xf32, #tpu.memory_space<vmem>>, vector<8x256xf32>,
    return
  }
  func.func @transform_0(%arg0: i32) -> (i32, i32) {
    %c0_i32 = arith.constant 0 : i32
    %c0_i32_0 = arith.constant 0 : i32
    return %arg0, %c0_i32 : i32, i32
  }
  func.func @transform_1(%arg0: i32) -> (i32, i32) {
    %c0_i32 = arith.constant 0 : i32
    %c0_i32_0 = arith.constant 0 : i32
    %c0_i32_1 = arith.constant 0 : i32
    return %c0_i32, %c0_i32_0 : i32, i32
  }
  func.func @transform_2(%arg0: i32) -> (i32, i32) {
    %c0_i32 = arith.constant 0 : i32
    %c0_i32_0 = arith.constant 0 : i32
    %c0_i32_1 = arith.constant 0 : i32
    return %c0_i32, %c0_i32_0 : i32, i32
  }
  func.func @transform_3(%arg0: i32) -> (i32, i32) {
    %c0_i32 = arith.constant 0 : i32
    %c0_i32_0 = arith.constant 0 : i32
    %c0_i32_1 = arith.constant 0 : i32
    return %c0_i32, %c0_i32_0 : i32, i32
  }
  func.func @transform_4(%arg0: i32) -> (i32, i32) {
    %c0_i32 = arith.constant 0 : i32
    %c0_i32_0 = arith.constant 0 : i32
    %c0_i32_1 = arith.constant 0 : i32
    return %c0_i32, %c0_i32_0 : i32, i32
  }
  func.func @transform_5(%arg0: i32) -> (i32, i32) {
    %c0_i32 = arith.constant 0 : i32
    %c0_i32_0 = arith.constant 0 : i32
    %c0_i32_1 = arith.constant 0 : i32
    return %c0_i32, %c0_i32_0 : i32, i32
  }
  func.func @transform_6(%arg0: i32) -> (i32, i32) {
    %c0_i32 = arith.constant 0 : i32
    %c0_i32_0 = arith.constant 0 : i32
    %c0_i32_1 = arith.constant 0 : i32
    return %c0_i32, %c0_i32_0 : i32, i32
  }
  func.func @transform_7(%arg0: i32) -> (i32, i32) {
    %c0_i32 = arith.constant 0 : i32
    %c0_i32_0 = arith.constant 0 : i32
    %c0_i32_1 = arith.constant 0 : i32
    return %c0_i32, %c0_i32_0 : i32, i32
  }
  func.func @transform_8(%arg0: i32) -> (i32, i32) {
    %c0_i32 = arith.constant 0 : i32
    %c0_i32_0 = arith.constant 0 : i32
    %c0_i32_1 = arith.constant 0 : i32
    return %c0_i32, %c0_i32_0 : i32, i32
  }
  func.func @transform_9(%arg0: i32) -> (i32, i32) {
    %c0_i32 = arith.constant 0 : i32
    %c0_i32_0 = arith.constant 0 : i32
    %c0_i32_1 = arith.constant 0 : i32
    return %c0_i32, %c0_i32_0 : i32, i32
  }
  func.func @transform_10(%arg0: i32) -> (i32, i32) {
    %c0_i32 = arith.constant 0 : i32
    %c0_i32_0 = arith.constant 0 : i32
    %c0_i32_1 = arith.constant 0 : i32
    return %c0_i32, %c0_i32_0 : i32, i32
  }
  func.func @transform_11(%arg0: i32) -> (i32, i32) {
    %c0_i32 = arith.constant 0 : i32
    %c0_i32_0 = arith.constant 0 : i32
    %c0_i32_1 = arith.constant 0 : i32
    return %c0_i32, %c0_i32_0 : i32, i32
  }
  func.func @transform_12(%arg0: i32) -> (i32, i32) {
    %c0_i32 = arith.constant 0 : i32
    %c0_i32_0 = arith.constant 0 : i32
    return %arg0, %c0_i32 : i32, i32
  }
}

</mosaic_0001>

<bundles_post_ra>
// kernel: llama_decoder_layer.1
= control target key start
LH: loop header
LB: loop body
LE: loop exit
PB: predicated region body
PF: predicated region fallthrough
CT: control target
= control target key end

     0   :  { %17 = vsyncpa [#allocation3], 0  ;;  %s5357_s0 = inlined_call_operand.vmem [shape: f32[16,256], index: 0, kind: input, shape index: {}]   ;;  %s5358_s1 = inlined_call_operand.vmem [shape: f32[8,128], index: 1, kind: input, shape index: {}]   ;;  %s5359_s2 = inlined_call_operand.vmem [shape: f32[8,128], index: 2, kind: input, shape index: {}]   ;;  %s5360_s3 = inlined_call_operand.vmem [shape: bf16[256,256], index: 3, kind: input, shape index: {}]   ;;  %s5361_s4 = inlined_call_operand.vmem [shape: bf16[256,256], index: 4, kind: input, shape index: {}]   ;;  %s5362_s5 = inlined_call_operand.vmem [shape: bf16[256,256], index: 5, kind: input, shape index: {}]   ;;  %s5363_s6 = inlined_call_operand.vmem [shape: bf16[256,256], index: 6, kind: input, shape index: {}]   ;;  %s5364_s7 = inlined_call_operand.vmem [shape: bf16[256,512], index: 7, kind: input, shape index: {}]   ;;  %s5365_s8 = inlined_call_operand.vmem [shape: bf16[256,512], index: 8, kind: input, shape index: {}]   ;;  %s5366_s9 = inlined_call_operand.vmem [shape: bf16[512,256], index: 9, kind: input, shape index: {}]   ;;  %s5367_s10 = inlined_call_operand.vmem [shape: f32[1,256], index: 10, kind: input, shape index: {}]   ;;  %s5368_s11 = inlined_call_operand.vmem [shape: f32[1,256], index: 11, kind: input, shape index: {}]   ;;  %s5369_s12 = inlined_call_operand.hbm [shape: f32[16,256], index: 12, kind: output, shape index: {}]  }
   0x1   :  { %19 = vsyncpa [#allocation3 + $0x1], 0  ;;  %s4210_s21 = smov 0   ;;  %s4212_s22 = smov 0  }
   0x2   :  { %s4214_s23 = smov 0   ;;  %s4216_s24 = smov 0  }
   0x3 LB: > { %5373 = sst [smem:[#allocation5_spill]] %s4135_s23  ;;  %s4231_s25 = sadd.s32 4294967295, %s4139_s24   ;;  %s4139_s24 = sphi %s4216_s24, %s5378_s24   ;;  %s4135_s23 = sphi %s4214_s23, %s5380_s23   ;;  %s4131_s22 = sphi %s4212_s22, %s5382_s22   ;;  %s4127_s21 = sphi %s4210_s21, %s5381_s21  }
   0x4   : > { %s3153_s26 = sadd.s32 4294967294, %s4139_s24   ;;  %s4235_s27 = sadd.s32 1, %s4139_s24  }
   0x5   : > { %5374 = sst [smem:[#allocation6_spill]] %s4235_s27  ;;  %s289_s28 = sadd.s32 1, %s4135_s23 }
   0x6   : > { %s286_s29 = ssub.s32 %s4139_s24, %s4235_s27  ;;  %p299_p0 = scmp.ne.s32.totalorder %s4135_s23, %s4131_s22 }
   0x7   : > { %p287_p1 = scmp.eq.s32.totalorder %s286_s29, 0  ;;  %p300_p2 = scmp.eq.s32.totalorder %s4231_s25, 1 }
   0x8   : > { %p305_p3 = scmp.ne.s32.totalorder %s4131_s22, %s4127_s21  ;;  %p306_p4 = scmp.eq.s32.totalorder %s3153_s26, 1 }
   0x9   : > { %s4246_s30 = scalar_select %p287_p1, %s4135_s23, %s289_s28  }
   0xa   : > { %p4248_p5 = por %p300_p2, %p299_p0  ;;  %p4252_p6 = por %p306_p4, %p305_p3 }
   0xb   : > { %5375 = sst [smem:[#allocation7_spill]] %s4246_s30  ;;  %p3156_p7 = scmp.ge.s32.totalorder %s4139_s24, 1 }
   0xc   : > { %p365_p8 = scmp.lt.s32.totalorder %s4139_s24, 3 }
   0xe   : > { %p366_p9 = pnand %p3156_p7, %p365_p8 }
   0xf   : > { %p407_p10 = scmp.lt.s32.totalorder (!%p366_p9), %s4231_s25, 1  ;;  %v3567_v0 = vld [vmem:[%s5360_s3 + $0x4] ss:$8 sps:$4 sm:$0xff] (!%p366_p9)   ;;  %v3569_v1 = vld [vmem:[%s5360_s3] ss:$8 sps:$4 sm:$0xff] (!%p366_p9)   ;;  %s4142_s29 = smov (!%p366_p9), 64  }
  0x10   : > { %369 = sbr.rel (%p366_p9) target bundleno = 2184 (0x888), region = 68  ;;  %634 = vmatprep.subr.bf16.mxu0 (!%p366_p9), %v3567_v0  ;;  %v3570_v2 = vld [vmem:[%s5361_s4 + $0x4] ss:$8 sps:$4 sm:$0xff] (!%p366_p9)   ;;  %v3572_v3 = vld [vmem:[%s5361_s4] ss:$8 sps:$4 sm:$0xff] (!%p366_p9)   ;;  %vm4143_vm0 = vmmov (!%p366_p9), 0  }
  0x11   : > { %635 = vmatpush1.bf16.msra.mxu0 (!%p366_p9), %v3569_v1  ;;  %v3573_v4 = vld [vmem:[%s5360_s3 + $0x14] ss:$8 sps:$4 sm:$0xff] (!%p366_p9)   ;;  %v3575_v5 = vld [vmem:[%s5360_s3 + $0x10] ss:$8 sps:$4 sm:$0xff] (!%p366_p9)   ;;  %867 = vmatprep.subr.bf16.mxu1 (!%p366_p9), %v3570_v2  ;;  %v3579_v10 = vld [vmem:[%s5360_s3 + $0x24] ss:$8 sps:$4 sm:$0xff] (!%p366_p9)  }
  0x12   : > { %v3576_v6 = vld [vmem:[%s5361_s4 + $0x14] ss:$8 sps:$4 sm:$0xff] (!%p366_p9)   ;;  %868 = vmatpush1.bf16.msra.mxu1 (!%p366_p9), %v3572_v3  ;;  %636 = vmatprep.subr.bf16.mxu0 (!%p366_p9), %v3573_v4  ;;  %v3578_v7 = vld [vmem:[%s5361_s4 + $0x10] ss:$8 sps:$4 sm:$0xff] (!%p366_p9)   ;;  %v3581_v13 = vld [vmem:[%s5360_s3 + $0x20] ss:$8 sps:$4 sm:$0xff] (!%p366_p9)  }
  0x13   : > { %869 = vmatprep.subr.bf16.mxu1 (!%p366_p9), %v3576_v6  ;;  %v3582_v14 = vld [vmem:[%s5361_s4 + $0x24] ss:$8 sps:$4 sm:$0xff] (!%p366_p9)   ;;  %v3584_v16 = vld [vmem:[%s5361_s4 + $0x20] ss:$8 sps:$4 sm:$0xff] (!%p366_p9)   ;;  %v3585_v17 = vld [vmem:[%s5360_s3 + $0x34] ss:$8 sps:$4 sm:$0xff] (!%p366_p9)  }
  0x14   : > { %v3588_v18 = vld [vmem:[%s5361_s4 + $0x34] ss:$8 sps:$4 sm:$0xff] (!%p366_p9)   ;;  %v3587_v19 = vld [vmem:[%s5360_s3 + $0x30] ss:$8 sps:$4 sm:$0xff] (!%p366_p9)   ;;  %v3591_v20 = vld [vmem:[%s5360_s3 + $0x44] ss:$8 sps:$4 sm:$0xff] (!%p366_p9)  }
  0x15   : > { %637 = vmatpush1.bf16.msra.mxu0 (!%p366_p9), %v3575_v5  ;;  %v3590_v21 = vld [vmem:[%s5361_s4 + $0x30] ss:$8 sps:$4 sm:$0xff] (!%p366_p9)   ;;  %v3594_v22 = vld [vmem:[%s5361_s4 + $0x44] ss:$8 sps:$4 sm:$0xff] (!%p366_p9)   ;;  %v3593_v23 = vld [vmem:[%s5360_s3 + $0x40] ss:$8 sps:$4 sm:$0xff] (!%p366_p9)  }
  0x16   : > { %638 = vmatprep.subr.bf16.mxu0 (!%p366_p9), %v3579_v10  ;;  %870 = vmatpush1.bf16.msra.mxu1 (!%p366_p9), %v3578_v7  ;;  %v3597_v24 = vld [vmem:[%s5360_s3 + $0x54] ss:$8 sps:$4 sm:$0xff] (!%p366_p9)   ;;  %v3596_v25 = vld [vmem:[%s5361_s4 + $0x40] ss:$8 sps:$4 sm:$0xff] (!%p366_p9)   ;;  %v3599_v27 = vld [vmem:[%s5360_s3 + $0x50] ss:$8 sps:$4 sm:$0xff] (!%p366_p9)   ;;  %v428_v10 = vlaneseq (!%p366_p9) }
  0x17   : > { %s408_s19 = scalar_select %p407_p10, %s4231_s25, 1  ;;  %871 = vmatprep.subr.bf16.mxu1 %v3582_v14  ;;  %v3600_v26 = vld [vmem:[%s5361_s4 + $0x54] ss:$8 sps:$4 sm:$0xff]   ;;  %v3603_v28 = vld [vmem:[%s5360_s3 + $0x64] ss:$8 sps:$4 sm:$0xff]   ;;  %vm1288_vm1 = vcmask 1043456  }
  0x18   : > { %v3602_v29 = vld [vmem:[%s5361_s4 + $0x50] ss:$8 sps:$4 sm:$0xff]   ;;  %v3606_v30 = vld [vmem:[%s5361_s4 + $0x64] ss:$8 sps:$4 sm:$0xff]   ;;  %v3605_v31 = vld [vmem:[%s5360_s3 + $0x60] ss:$8 sps:$4 sm:$0xff]  }
  0x19   : > { %s3491_s17 = sshll.u32 %s408_s19, 4  ;;  %639 = vmatpush1.bf16.msra.mxu0 %v3581_v13  ;;  %v3609_v32 = vld [vmem:[%s5360_s3 + $0x74] ss:$8 sps:$4 sm:$0xff]   ;;  %v3608_v33 = vld [vmem:[%s5361_s4 + $0x60] ss:$8 sps:$4 sm:$0xff]   ;;  %vm1260_vm3 = vcmask 64512  }
  0x1a   : > { %s4284_s28 = scalar_lea.vmem %s5357_s0, %s3491_s17  ;;  %640 = vmatprep.subr.bf16.mxu0 %v3585_v17  ;;  %872 = vmatpush1.bf16.msra.mxu1 %v3584_v16  ;;  %v3612_v34 = vld [vmem:[%s5361_s4 + $0x74] ss:$8 sps:$4 sm:$0xff]   ;;  %v3611_v35 = vld [vmem:[%s5360_s3 + $0x70] ss:$8 sps:$4 sm:$0xff]   ;;  %v3615_v36 = vld [vmem:[%s5360_s3 + $0x84] ss:$8 sps:$4 sm:$0xff]  }
  0x1b   : > { %v4290_v8 = vld [vmem:[%s4284_s28] sm:$0xff]  ;;  %v4293_v9 = vld [vmem:[%s4284_s28 + $0x8] sm:$0xff]  ;;  %873 = vmatprep.subr.bf16.mxu1 %v3588_v18  ;;  %v3614_v37 = vld [vmem:[%s5361_s4 + $0x70] ss:$8 sps:$4 sm:$0xff]   ;;  %s404_s15 = sand.u32 1, %s4131_s22   ;;  %s3492_s17 = sshll.u32 %s4231_s25, 8 }
  0x1c   : > { %v415_v11 = vmul.f32 %v4290_v8, %v4290_v8  ;;  %v416_v12 = vmul.f32 %v4293_v9, %v4293_v9  ;;  %v3618_v38 = vld [vmem:[%s5361_s4 + $0x84] ss:$8 sps:$4 sm:$0xff]   ;;  %v3617_v39 = vld [vmem:[%s5360_s3 + $0x80] ss:$8 sps:$4 sm:$0xff]   ;;  %v3621_v40 = vld [vmem:[%s5360_s3 + $0x94] ss:$8 sps:$4 sm:$0xff]   ;;  %s5315_s23 = scalar_lea.hbm %s5369_s12, %s3492_s17 }
  0x1d   : > { %641 = vmatpush1.bf16.msra.mxu0 %v3587_v19  ;;  %v3620_v41 = vld [vmem:[%s5361_s4 + $0x80] ss:$8 sps:$4 sm:$0xff]   ;;  %v3624_v42 = vld [vmem:[%s5361_s4 + $0x94] ss:$8 sps:$4 sm:$0xff]   ;;  %v3623_v43 = vld [vmem:[%s5360_s3 + $0x90] ss:$8 sps:$4 sm:$0xff]  }
  0x1e   : > { %v417_v15 = vadd.f32 %v416_v12, %v415_v11  ;;  %642 = vmatprep.subr.bf16.mxu0 %v3591_v20  ;;  %874 = vmatpush1.bf16.msra.mxu1 %v3590_v21  ;;  %v3627_v44 = vld [vmem:[%s5360_s3 + $0xa4] ss:$8 sps:$4 sm:$0xff]   ;;  %v3626_v45 = vld [vmem:[%s5361_s4 + $0x90] ss:$8 sps:$4 sm:$0xff]   ;;  %v3629_v47 = vld [vmem:[%s5360_s3 + $0xa0] ss:$8 sps:$4 sm:$0xff]  }
  0x1f   : > { %875 = vmatprep.subr.bf16.mxu1 %v3594_v22  ;;  %v3630_v46 = vld [vmem:[%s5361_s4 + $0xa4] ss:$8 sps:$4 sm:$0xff]   ;;  %v3633_v48 = vld [vmem:[%s5360_s3 + $0xb4] ss:$8 sps:$4 sm:$0xff]   ;;  %v3632_v49 = vld [vmem:[%s5361_s4 + $0xa0] ss:$8 sps:$4 sm:$0xff]  }
  0x20   : > { %418 = vadd.xlane.f32.xlu0 %v417_v15  ;;  %v3636_v50 = vld [vmem:[%s5361_s4 + $0xb4] ss:$8 sps:$4 sm:$0xff]   ;;  %v3635_v51 = vld [vmem:[%s5360_s3 + $0xb0] ss:$8 sps:$4 sm:$0xff]   ;;  %v3639_v53 = vld [vmem:[%s5360_s3 + $0xc4] ss:$8 sps:$4 sm:$0xff]  }
  0x21   : > { %643 = vmatpush1.bf16.msra.mxu0 %v3593_v23  ;;  %v3638_v52 = vld [vmem:[%s5361_s4 + $0xb0] ss:$8 sps:$4 sm:$0xff]   ;;  %v3641_v54 = vld [vmem:[%s5360_s3 + $0xc0] ss:$8 sps:$4 sm:$0xff]   ;;  %v3642_v55 = vld [vmem:[%s5361_s4 + $0xc4] ss:$8 sps:$4 sm:$0xff]  }
  0x22   : > { %644 = vmatprep.subr.bf16.mxu0 %v3597_v24  ;;  %876 = vmatpush1.bf16.msra.mxu1 %v3596_v25  ;;  %v3644_v56 = vld [vmem:[%s5361_s4 + $0xc0] ss:$8 sps:$4 sm:$0xff]   ;;  %v3645_v57 = vld [vmem:[%s5360_s3 + $0xd4] ss:$8 sps:$4 sm:$0xff]   ;;  %v3647_v59 = vld [vmem:[%s5360_s3 + $0xd0] ss:$8 sps:$4 sm:$0xff]  }
  0x23   : > { %877 = vmatprep.subr.bf16.mxu1 %v3600_v26  ;;  %v3648_v58 = vld [vmem:[%s5361_s4 + $0xd4] ss:$8 sps:$4 sm:$0xff]   ;;  %v3650_v60 = vld [vmem:[%s5361_s4 + $0xd0] ss:$8 sps:$4 sm:$0xff]   ;;  %v3651_v61 = vld [vmem:[%s5360_s3 + $0xe4] ss:$8 sps:$4 sm:$0xff]  }
  0x24   : > { %v3654_v62 = vld [vmem:[%s5361_s4 + $0xe4] ss:$8 sps:$4 sm:$0xff]   ;;  %v3653_v63 = vld [vmem:[%s5360_s3 + $0xe0] ss:$8 sps:$4 sm:$0xff]   ;;  %v3657_v1 = vld [vmem:[%s5360_s3 + $0xf4] ss:$8 sps:$4 sm:$0xff]  }
  0x25   : > { %645 = vmatpush1.bf16.msra.mxu0 %v3599_v27  ;;  %v3656_v0 = vld [vmem:[%s5361_s4 + $0xe0] ss:$8 sps:$4 sm:$0xff]   ;;  %v3660_v2 = vld [vmem:[%s5361_s4 + $0xf4] ss:$8 sps:$4 sm:$0xff]   ;;  %v3659_v3 = vld [vmem:[%s5360_s3 + $0xf0] ss:$8 sps:$4 sm:$0xff]  }
  0x26   : > { %646 = vmatprep.subr.bf16.mxu0 %v3603_v28  ;;  %878 = vmatpush1.bf16.msra.mxu1 %v3602_v29  ;;  %v3662_v4 = vld [vmem:[%s5361_s4 + $0xf0] ss:$8 sps:$4 sm:$0xff]   ;;  %v3665_v5 = vld [vmem:[%s5362_s5 + $0x4] ss:$8 sps:$4 sm:$0xff]   ;;  %v4471_v12 = vshrl.u32 %v428_v10, 7  ;;  %s3157_s16 = sshll.u32 %s404_s15, 4 }
  0x27   : > { %879 = vmatprep.subr.bf16.mxu1 %v3606_v30  ;;  %v422_v15 = vld [vmem:[%s5367_s10] sm:$0x3]  ;;  %v3668_v26 = vld [vmem:[%s5362_s5 + $0x14] ss:$8 sps:$4 sm:$0xff]   ;;  %v3672_v29 = vld [vmem:[%s5362_s5 + $0x30] ss:$8 sps:$4 sm:$0xff]  }
  0x28   : > { %v434_v13 = vsub.s32 1, %v4471_v12  ;;  %v430_v14 = vsub.s32 0, %v4471_v12  ;;  %v3663_v24 = vld [vmem:[%s5362_s5] ss:$8 sps:$4 sm:$0xff]   ;;  %v3674_v28 = vld [vmem:[%s5362_s5 + $0x34] ss:$8 sps:$4 sm:$0xff]  }
  0x29   : > { %647 = vmatpush1.bf16.msra.mxu0 %v3605_v31  ;;  %v3669_v27 = vld [vmem:[%s5362_s5 + $0x20] ss:$8 sps:$4 sm:$0xff]   ;;  %v3677_v30 = vld [vmem:[%s5362_s5 + $0x44] ss:$8 sps:$4 sm:$0xff]   ;;  %s406_s18 = scalar_lea.vmem [#allocation2], %s3157_s16  ;;  %s3080_s25 = scalar_lea.sflag [#allocation3], %s404_s15 }
  0x2a   : > { %648 = vmatprep.subr.bf16.mxu0 %v3609_v32  ;;  %880 = vmatpush1.bf16.msra.mxu1 %v3608_v33  ;;  %v435_v16 = vrot.slane %v422_v15, %v434_v13  ;;  %v431_v17 = vrot.slane %v422_v15, %v430_v14  ;;  %v3675_v31 = vld [vmem:[%s5362_s5 + $0x40] ss:$8 sps:$4 sm:$0xff]   ;;  %v3680_v32 = vld [vmem:[%s5362_s5 + $0x54] ss:$8 sps:$4 sm:$0xff]   ;;  %v3678_v33 = vld [vmem:[%s5362_s5 + $0x50] ss:$8 sps:$4 sm:$0xff]  }
  0x2b   : > { %881 = vmatprep.subr.bf16.mxu1 %v3612_v34  ;;  %v3683_v34 = vld [vmem:[%s5362_s5 + $0x64] ss:$8 sps:$4 sm:$0xff]   ;;  %s3094_s20 = sshll.u32 %s406_s18, 4  ;;  %s4144_s27 = smov [#allocation2]   ;;  %s5317_s20 = int_to_ptr.vmem [resolvable:$true] %s3094_s20 }
  0x2c   : > { %v1143_v15 = vld [vmem:[%s5358_s1] sm:$0xff]  ;;  %s4077_s30 = scalar_lea.vmem %s5317_s20, 256  ;;  %s4081_s19 = sshll.u32 %s4144_s27, 4  ;;  %s4082_s19 = int_to_ptr.vmem [resolvable:$false] %s4081_s19 }
  0x2d   : > { %649 = vmatpush1.bf16.msra.mxu0 %v3611_v35  ;;  %v3681_v35 = vld [vmem:[%s5362_s5 + $0x60] ss:$8 sps:$4 sm:$0xff]   ;;  %p4078_p11 = scmp.ne.s32.totalorder %s5317_s20, %s4077_s30  ;;  %p4084_p0 = scmp.lt.s32.totalorder %s5317_s20, %s4082_s19 }
  0x2e   : > { %650 = vmatprep.subr.bf16.mxu0 %v3615_v36  ;;  %882 = vmatpush1.bf16.msra.mxu1 %v3614_v37  ;;  %v3686_v36 = vld [vmem:[%s5362_s5 + $0x74] ss:$8 sps:$4 sm:$0xff]   ;;  %v3684_v37 = vld [vmem:[%s5362_s5 + $0x70] ss:$8 sps:$4 sm:$0xff]  }
  0x2f   : > { %883 = vmatprep.subr.bf16.mxu1 %v3618_v38  ;;  %v3689_v38 = vld [vmem:[%s5362_s5 + $0x84] ss:$8 sps:$4 sm:$0xff]   ;;  %p4079_p12 = pnand %p4078_p11, %p4248_p5 }
  0x31   : > { %651 = vmatpush1.bf16.msra.mxu0 %v3617_v39  ;;  %v3687_v39 = vld [vmem:[%s5362_s5 + $0x80] ss:$8 sps:$4 sm:$0xff]   ;;  %p4080_p13 = pneg %p4079_p12 }
  0x32   : > { %652 = vmatprep.subr.bf16.mxu0 %v3621_v40  ;;  %884 = vmatpush1.bf16.msra.mxu1 %v3620_v41  ;;  %v3692_v40 = vld [vmem:[%s5362_s5 + $0x94] ss:$8 sps:$4 sm:$0xff]   ;;  %v3690_v41 = vld [vmem:[%s5362_s5 + $0x90] ss:$8 sps:$4 sm:$0xff]  }
  0x33   : > { %885 = vmatprep.subr.bf16.mxu1 %v3624_v42  ;;  %v3695_v42 = vld [vmem:[%s5362_s5 + $0xa4] ss:$8 sps:$4 sm:$0xff]  }
  0x35   : > { %653 = vmatpush1.bf16.msra.mxu0 %v3623_v43  ;;  %v3693_v43 = vld [vmem:[%s5362_s5 + $0xa0] ss:$8 sps:$4 sm:$0xff]  }
  0x36   : > { %654 = vmatprep.subr.bf16.mxu0 %v3627_v44  ;;  %886 = vmatpush1.bf16.msra.mxu1 %v3626_v45  ;;  %v3698_v44 = vld [vmem:[%s5362_s5 + $0xb4] ss:$8 sps:$4 sm:$0xff]   ;;  %v3696_v45 = vld [vmem:[%s5362_s5 + $0xb0] ss:$8 sps:$4 sm:$0xff]  }
  0x37   : > { %887 = vmatprep.subr.bf16.mxu1 %v3630_v46  ;;  %v3701_v46 = vld [vmem:[%s5362_s5 + $0xc4] ss:$8 sps:$4 sm:$0xff]  }
  0x39   : > { %655 = vmatpush1.bf16.msra.mxu0 %v3629_v47  ;;  %v3699_v47 = vld [vmem:[%s5362_s5 + $0xc0] ss:$8 sps:$4 sm:$0xff]  }
  0x3a   : > { %656 = vmatprep.subr.bf16.mxu0 %v3633_v48  ;;  %888 = vmatpush1.bf16.msra.mxu1 %v3632_v49  ;;  %v3704_v48 = vld [vmem:[%s5362_s5 + $0xd4] ss:$8 sps:$4 sm:$0xff]   ;;  %v3702_v49 = vld [vmem:[%s5362_s5 + $0xd0] ss:$8 sps:$4 sm:$0xff]  }
  0x3b   : > { %889 = vmatprep.subr.bf16.mxu1 %v3636_v50  ;;  %v3707_v50 = vld [vmem:[%s5362_s5 + $0xe4] ss:$8 sps:$4 sm:$0xff]  }
  0x3d   : > { %657 = vmatpush1.bf16.msra.mxu0 %v3635_v51  ;;  %v3705_v51 = vld [vmem:[%s5362_s5 + $0xe0] ss:$8 sps:$4 sm:$0xff]  }
  0x3e   : > { %658 = vmatprep.subr.bf16.mxu0 %v3639_v53  ;;  %890 = vmatpush1.bf16.msra.mxu1 %v3638_v52  ;;  %v3710_v52 = vld [vmem:[%s5362_s5 + $0xf4] ss:$8 sps:$4 sm:$0xff]   ;;  %v3708_v53 = vld [vmem:[%s5362_s5 + $0xf0] ss:$8 sps:$4 sm:$0xff]  }
  0x3f   : > { %891 = vmatprep.subr.bf16.mxu1 %v3642_v55 }
  0x41   : > { %659 = vmatpush1.bf16.msra.mxu0 %v3641_v54  ;;  %v4141_v54 = vmov 0.0  }
  0x42   : > { %660 = vmatprep.subr.bf16.mxu0 %v3645_v57  ;;  %892 = vmatpush1.bf16.msra.mxu1 %v3644_v56 }
  0x43   : > { %893 = vmatprep.subr.bf16.mxu1 %v3648_v58 }
  0x45   : > { %661 = vmatpush1.bf16.msra.mxu0 %v3647_v59 }
  0x46   : > { %662 = vmatprep.subr.bf16.mxu0 %v3651_v61  ;;  %894 = vmatpush1.bf16.msra.mxu1 %v3650_v60 }
  0x47   : > { %895 = vmatprep.subr.bf16.mxu1 %v3654_v62 }
  0x49   : > { %663 = vmatpush1.bf16.msra.mxu0 %v3653_v63 }
  0x4a   : > { %664 = vmatprep.subr.bf16.mxu0 %v3657_v1  ;;  %896 = vmatpush1.bf16.msra.mxu1 %v3656_v0 }
  0x4b   : > { %897 = vmatprep.subr.bf16.mxu1 %v3660_v2 }
  0x4d   : > { %665 = vmatpush1.bf16.msra.mxu0 %v3659_v3 }
  0x4e   : > { %1100 = vmatprep.subr.bf16.mxu0 %v3665_v5  ;;  %898 = vmatpush1.bf16.msra.mxu1 %v3662_v4 }
  0x4f   : > { %3513 = vmatprep.subr.bf16.mxu1 %v4141_v54 }
  0xad   : > { %v419_v6 = vpop.xlane.xlu0 %418 }
  0xae   : > { %v421_v7 = vmul.f32 0.00390625, %v419_v6 }
  0xb0   : > { %v423_v11 = vadd.f32 1e-06, %v421_v7 }
  0xb2   : > { %4047 = vrsqrt.f32 %v423_v11 }
  0xbc   : > { %v4048_v18 = vpop.eup %4047 }
  0xbd   : > { %v426_v19 = vmul.f32 %v4048_v18, %v4293_v9  ;;  %v425_v20 = vmul.f32 %v4048_v18, %v4290_v8  ;;  %v3666_v8 = vld [vmem:[%s5362_s5 + $0x10] ss:$8 sps:$4 sm:$0xff]   ;;  %v3671_v9 = vld [vmem:[%s5362_s5 + $0x24] ss:$8 sps:$4 sm:$0xff]  }
  0xbf   : > { %v439_v21 = vmul.f32 %v435_v16, %v426_v19  ;;  %v438_v22 = vmul.f32 %v431_v17, %v425_v20  ;;  %v1144_v16 = vld [vmem:[%s5359_s2] sm:$0xff] }
  0xc1   : > { %v441_v23 = vpack.c.bf16 %v439_v21, %v439_v21  ;;  %v4487_v25 = vpack.c.bf16 %v438_v22, %v438_v22 }
  0xc3   : > { %666 = vmatprep.mubr.bf16.mxu0 %v441_v23  ;;  %899 = vmatprep.mubr.bf16.mxu1 %v441_v23 }
  0xc4   : > { %667 = vmatmul.mubr.bf16.vlgmr.msra.gmra.mrb[0].mxu0 %v4487_v25  ;;  %900 = vmatmul.mubr.bf16.vlgmr.msra.gmra.mrb[0].mxu1 %v4487_v25 }
  0xc5   : > { %1101 = vmatpush1.bf16.msra.mxu0 %v3663_v24  ;;  %1132 = vmatprep.mubr.bf16.mxu0 %v441_v23 }
  0xc6   : > { %1102 = vmatprep.subr.bf16.mxu0 %v3668_v26  ;;  %3515 = vmatprep.mubr.msk.bf16.mxu1 %vm4143_vm0, %v4141_v54 }
  0xc9   : > { %1103 = vmatpush1.bf16.msra.mxu0 %v3666_v8 }
  0xca   : > { %1104 = vmatprep.subr.bf16.mxu0 %v3671_v9 }
  0xcd   : > { %1105 = vmatpush1.bf16.msra.mxu0 %v3669_v27 }
  0xce   : > { %1106 = vmatprep.subr.bf16.mxu0 %v3674_v28 }
  0xd1   : > { %1107 = vmatpush1.bf16.msra.mxu0 %v3672_v29 }
  0xd2   : > { %1108 = vmatprep.subr.bf16.mxu0 %v3677_v30 }
  0xd5   : > { %1109 = vmatpush1.bf16.msra.mxu0 %v3675_v31 }
  0xd6   : > { %1110 = vmatprep.subr.bf16.mxu0 %v3680_v32 }
  0xd9   : > { %1111 = vmatpush1.bf16.msra.mxu0 %v3678_v33 }
  0xda   : > { %1112 = vmatprep.subr.bf16.mxu0 %v3683_v34 }
  0xdd   : > { %1113 = vmatpush1.bf16.msra.mxu0 %v3681_v35  ;;  %v1254_v35 = vand.u32 127, %v428_v10 }
  0xde   : > { %1114 = vmatprep.subr.bf16.mxu0 %v3686_v36 }
  0xdf   : > { %vm1255_vm2 = vcmp.ge.s32.totalorder %v4471_v12, %v1254_v35  ;;  %v3758_v35 = vld [vmem:[%s5363_s6 + $0xf4] ss:$8 sps:$4 sm:$0xff]  }
  0xe0   : > { %v3863_v12 = vld [vmem:[%s5365_s8 + $0x24] ss:$16 sps:$4 sm:$0xff]  }
  0xe1   : > { %1115 = vmatpush1.bf16.msra.mxu0 %v3684_v37 }
  0xe2   : > { %1116 = vmatprep.subr.bf16.mxu0 %v3689_v38 }
  0xe5   : > { %1117 = vmatpush1.bf16.msra.mxu0 %v3687_v39 }
  0xe6   : > { %1118 = vmatprep.subr.bf16.mxu0 %v3692_v40 }
  0xe9   : > { %1119 = vmatpush1.bf16.msra.mxu0 %v3690_v41 }
  0xea   : > { %1120 = vmatprep.subr.bf16.mxu0 %v3695_v42 }
  0xed   : > { %1121 = vmatpush1.bf16.msra.mxu0 %v3693_v43 }
  0xee   : > { %1122 = vmatprep.subr.bf16.mxu0 %v3698_v44 }
  0xf1   : > { %1123 = vmatpush1.bf16.msra.mxu0 %v3696_v45 }
  0xf2   : > { %1124 = vmatprep.subr.bf16.mxu0 %v3701_v46 }
  0xf5   : > { %1125 = vmatpush1.bf16.msra.mxu0 %v3699_v47 }
  0xf6   : > { %1126 = vmatprep.subr.bf16.mxu0 %v3704_v48 }
  0xf9   : > { %1127 = vmatpush1.bf16.msra.mxu0 %v3702_v49 }
  0xfa   : > { %1128 = vmatprep.subr.bf16.mxu0 %v3707_v50 }
  0xfd   : > { %1129 = vmatpush1.bf16.msra.mxu0 %v3705_v51 }
  0xfe   : > { %1130 = vmatprep.subr.bf16.mxu0 %v3710_v52 }
 0x101   : > { %1131 = vmatpush1.bf16.msra.mxu0 %v3708_v53 }
 0x102   : > { %3501 = vmatprep.subr.bf16.mxu0 %v4141_v54 }
 0x104   : > { %1133 = vmatmul.mubr.bf16.vlgmr.msra.gmra.mrb[4].mxu0 %v4487_v25 }
 0x105   : > { %3503 = vmatprep.mubr.msk.bf16.mxu0 %vm4143_vm0, %v4141_v54 }
 0x197   : > { %v668_v55 = vpop.f32.mrb[0].mxu0  ;;  %v901_v56 = vpop.f32.mrb[0].mxu1 }
 0x198   : > { %v1141_v57 = vmul.f32 0.088388346, %v668_v55  ;;  %1152 = vrot.lane.b32.xlu0 %v901_v56, %s4142_s29  ;;  %v670_v58 = vpop.f32.mrb[1].mxu0  ;;  %v903_v59 = vpop.f32.mrb[1].mxu1  ;;  %v1151_v18 = vmul.f32 %v1143_v15, %v901_v56 }
 0x199   : > { %v672_v60 = vpop.f32.mrb[2].mxu0  ;;  %v905_v61 = vpop.f32.mrb[2].mxu1  ;;  %v1142_v0 = vmul.f32 0.088388346, %v670_v58  ;;  %v1164_v26 = vmul.f32 %v1143_v15, %v903_v59 }
 0x19a   : > { %v906_v62 = vpop.f32.mrb[3].mxu1  ;;  %1146 = vrot.lane.b32.xlu1 %v1141_v57, %s4142_s29  ;;  %v673_v63 = vpop.f32.mrb[3].mxu0  ;;  %v1145_v24 = vmul.f32 %v1143_v15, %v1141_v57 }
 0x19b   : > { %v1158_v32 = vmul.f32 %v1143_v15, %v1142_v0  ;;  %v3713_v63 = vld [vmem:[%s5363_s6 + $0x4] ss:$8 sps:$4 sm:$0xff]  }
 0x19c   : > { %v3725_v15 = vld [vmem:[%s5363_s6 + $0x44] ss:$8 sps:$4 sm:$0xff]  }
 0x19e   : > { %1165 = vrot.lane.b32.xlu1 %v903_v59, %s4142_s29 }
 0x1a2   : > { %1159 = vrot.lane.b32.xlu1 %v1142_v0, %s4142_s29  ;;  %s4083_s29 = scalar_lea.vmem %s4082_s19, 512 }
 0x1a3   : > { %p4085_p1 = scmp.lt.s32.totalorder %s4083_s29, %s4077_s30 }
 0x1a5   : > { %p4086_p2 = por %p4085_p1, %p4084_p0 }
 0x1a7   : > { %p4087_p3 = pnand %p4086_p2, %p4080_p13 }
 0x1d7   : > { %v1134_v1 = vpop.f32.mrb[4].mxu0 }
 0x1d8   : > { %v1157_v2 = vpack.c.bf16 %v1134_v1, %v1134_v1  ;;  %v1136_v3 = vpop.f32.mrb[5].mxu0 }
 0x1d9   : > { %v1170_v4 = vpack.c.bf16 %v1136_v3, %v1136_v3  ;;  %v1138_v5 = vpop.f32.mrb[6].mxu0 }
 0x1da   : > { %v1290_v6 = vsel %vm1288_vm1, %v1157_v2, 0  ;;  %v1139_v7 = vpop.f32.mrb[7].mxu0  ;;  %v3711_v2 = vld [vmem:[%s5363_s6] ss:$8 sps:$4 sm:$0xff]   ;;  %v3714_v5 = vld [vmem:[%s5363_s6 + $0x10] ss:$8 sps:$4 sm:$0xff]  }
 0x1db   : > { %v4588_v11 = vsel %vm1288_vm1, %v1170_v4, 0  ;;  %3514 = vmatpush3.bf16.msra.mxu1 %v1290_v6  ;;  %v3716_v4 = vld [vmem:[%s5363_s6 + $0x14] ss:$8 sps:$4 sm:$0xff]   ;;  %v3717_v6 = vld [vmem:[%s5363_s6 + $0x20] ss:$8 sps:$4 sm:$0xff]  }
 0x1dc   : > { %3519 = vmatprep.subr.bf16.mxu1 %v4141_v54  ;;  %v3722_v7 = vld [vmem:[%s5363_s6 + $0x34] ss:$8 sps:$4 sm:$0xff]  }
 0x20a   : > { %v1153_v17 = vpop.permute.xlu0 %1152 }
 0x20b   : > { %v1154_v19 = vmul.f32 %v1153_v17, %v1144_v16  ;;  %v3728_v17 = vld [vmem:[%s5363_s6 + $0x54] ss:$8 sps:$4 sm:$0xff]  }
 0x20c   : > { %v1147_v20 = vpop.permute.xlu1 %1146 }
 0x20d   : > { %v1155_v21 = vadd.f32 %v1154_v19, %v1151_v18  ;;  %v1148_v22 = vmul.f32 %v1147_v20, %v1144_v16  ;;  %v3726_v18 = vld [vmem:[%s5363_s6 + $0x50] ss:$8 sps:$4 sm:$0xff]   ;;  %v3731_v19 = vld [vmem:[%s5363_s6 + $0x64] ss:$8 sps:$4 sm:$0xff]   ;;  %v3729_v20 = vld [vmem:[%s5363_s6 + $0x60] ss:$8 sps:$4 sm:$0xff]  }
 0x20f   : > { %v1156_v23 = vpack.c.bf16 %v1155_v21, %v1155_v21  ;;  %v1149_v9 = vadd.f32 %v1148_v22, %v1145_v24  ;;  %v3734_v21 = vld [vmem:[%s5363_s6 + $0x74] ss:$8 sps:$4 sm:$0xff]   ;;  %v3732_v22 = vld [vmem:[%s5363_s6 + $0x70] ss:$8 sps:$4 sm:$0xff]   ;;  %v3735_v24 = vld [vmem:[%s5363_s6 + $0x80] ss:$8 sps:$4 sm:$0xff]  }
 0x210   : > { %v1166_v25 = vpop.permute.xlu1 %1165 }
 0x211   : > { %v1167_v8 = vmul.f32 %v1166_v25, %v1144_v16  ;;  %3502 = vmatpush3.bf16.xpose.msra.mxu0 %v1156_v23  ;;  %v1150_v29 = vpack.c.bf16 %v1149_v9, %v1149_v9  ;;  %v3737_v23 = vld [vmem:[%s5363_s6 + $0x84] ss:$8 sps:$4 sm:$0xff]   ;;  %v3740_v25 = vld [vmem:[%s5363_s6 + $0x94] ss:$8 sps:$4 sm:$0xff]   ;;  %v3741_v9 = vld [vmem:[%s5363_s6 + $0xa0] ss:$8 sps:$4 sm:$0xff]  }
 0x212   : > { %3507 = vmatprep.subr.bf16.mxu0 %v4141_v54 }
 0x213   : > { %v1168_v27 = vadd.f32 %v1167_v8, %v1164_v26  ;;  %v3738_v26 = vld [vmem:[%s5363_s6 + $0x90] ss:$8 sps:$4 sm:$0xff]   ;;  %v3743_v8 = vld [vmem:[%s5363_s6 + $0xa4] ss:$8 sps:$4 sm:$0xff]  }
 0x214   : > { %v1160_v28 = vpop.permute.xlu1 %1159 }
 0x215   : > { %v1161_v30 = vmul.f32 %v1160_v28, %v1144_v16  ;;  %v1169_v31 = vpack.c.bf16 %v1168_v27, %v1168_v27  ;;  %v3723_v16 = vld [vmem:[%s5363_s6 + $0x40] ss:$8 sps:$4 sm:$0xff]   ;;  %v3746_v27 = vld [vmem:[%s5363_s6 + $0xb4] ss:$8 sps:$4 sm:$0xff]   ;;  %v3744_v28 = vld [vmem:[%s5363_s6 + $0xb0] ss:$8 sps:$4 sm:$0xff]  }
 0x217   : > { %v1162_v33 = vadd.f32 %v1161_v30, %v1158_v32  ;;  %v3747_v30 = vld [vmem:[%s5363_s6 + $0xc0] ss:$8 sps:$4 sm:$0xff]   ;;  %v3750_v32 = vld [vmem:[%s5363_s6 + $0xd0] ss:$8 sps:$4 sm:$0xff]  }
 0x218   : > { %3504 = vmatmul.mubr.bf16.vlgmr.msra.gmra.mrb[8].mxu0 %v1150_v29  ;;  %v3749_v29 = vld [vmem:[%s5363_s6 + $0xc4] ss:$8 sps:$4 sm:$0xff]  }
 0x219   : > { %3508 = vmatpush3.bf16.xpose.msra.mxu0 %v1169_v31  ;;  %3509 = vmatprep.mubr.msk.bf16.mxu0 %vm4143_vm0, %v4141_v54  ;;  %v1163_v34 = vpack.c.bf16 %v1162_v33, %v1162_v33  ;;  %v3752_v31 = vld [vmem:[%s5363_s6 + $0xd4] ss:$8 sps:$4 sm:$0xff]   ;;  %v3753_v33 = vld [vmem:[%s5363_s6 + $0xe0] ss:$8 sps:$4 sm:$0xff]  }
 0x220   : > { %3510 = vmatmul.mubr.bf16.vlgmr.msra.gmra.mrb[12].mxu0 %v1163_v34  ;;  %v3755_v34 = vld [vmem:[%s5363_s6 + $0xe4] ss:$8 sps:$4 sm:$0xff]  }
 0x2eb   : > { %v1205_v36 = vpop.f32.mrb[8].mxu0 }
 0x2ec   : > { %v1258_v37 = vsel %vm1255_vm2, %v1205_v36, -1e+30  ;;  %v3505_v38 = vpop.f32.mrb[9].mxu0  ;;  %v3756_v36 = vld [vmem:[%s5363_s6 + $0xf0] ss:$8 sps:$4 sm:$0xff]  }
 0x2ed   : > { %v1208_v39 = vpop.f32.mrb[10].mxu0  ;;  %v1261_v40 = vsel %vm1260_vm3, %v1258_v37, -inf }
 0x2ee   : > { %1262 = vmax.xlane.f32.xlu1 %v1261_v40  ;;  %v3506_v41 = vpop.f32.mrb[11].mxu0 }
 0x2f3   : > { %v1245_v42 = vpop.f32.mrb[12].mxu0 }
 0x2f4   : > { %v1259_v43 = vsel %vm1255_vm2, %v1245_v42, -1e+30  ;;  %v3511_v44 = vpop.f32.mrb[13].mxu0 }
 0x2f5   : > { %v1248_v45 = vpop.f32.mrb[14].mxu0  ;;  %v1264_v46 = vsel %vm1260_vm3, %v1259_v43, -inf }
 0x2f6   : > { %1265 = vmax.xlane.f32.xlu0 %v1264_v46  ;;  %v3512_v47 = vpop.f32.mrb[15].mxu0 }
 0x2f7   : > { %v3759_v47 = vld [vmem:[%s5364_s7] ss:$16 sps:$4 sm:$0xff]  }
 0x37b   : > { %v1263_v10 = vpop.xlane.xlu1 %1262 }
 0x37c   : > { %v1267_v48 = vsub.f32 %v1258_v37, %v1263_v10  ;;  %v3761_v10 = vld [vmem:[%s5364_s7 + $0x4] ss:$16 sps:$4 sm:$0xff]  }
 0x37d   : > { %2025 = vmatprep.subr.bf16.mxu0 %v3761_v10  ;;  %v3836_v10 = vld [vmem:[%s5364_s7 + $0x18c] ss:$16 sps:$4 sm:$0xff]  }
 0x37e   : > { %v1269_v49 = vmul.f32 1.442695, %v1267_v48  ;;  %v3762_v48 = vld [vmem:[%s5364_s7 + $0x8] ss:$16 sps:$4 sm:$0xff]   ;;  %2026 = vmatpush1.bf16.msra.mxu0 %v3759_v47 }
 0x37f   : > { %v3834_v47 = vld [vmem:[%s5364_s7 + $0x188] ss:$16 sps:$4 sm:$0xff]  }
 0x380   : > { %4049 = vpow2.f32 %v1269_v49  ;;  %v3764_v49 = vld [vmem:[%s5364_s7 + $0xc] ss:$16 sps:$4 sm:$0xff]  }
 0x383   : > { %v1266_v50 = vpop.xlane.xlu0 %1265 }
 0x384   : > { %v1268_v51 = vsub.f32 %v1259_v43, %v1266_v50  ;;  %v3767_v50 = vld [vmem:[%s5364_s7 + $0x24] ss:$16 sps:$4 sm:$0xff]  }
 0x385   : > { %2027 = vmatprep.subr.bf16.mxu0 %v3767_v50  ;;  %v3837_v50 = vld [vmem:[%s5364_s7 + $0x1a0] ss:$16 sps:$4 sm:$0xff]  }
 0x386   : > { %v1271_v52 = vmul.f32 1.442695, %v1268_v51  ;;  %v3770_v51 = vld [vmem:[%s5364_s7 + $0x2c] ss:$16 sps:$4 sm:$0xff]  }
 0x388   : > { %4051 = vpow2.f32 %v1271_v52  ;;  %v3765_v52 = vld [vmem:[%s5364_s7 + $0x20] ss:$16 sps:$4 sm:$0xff]  }
 0x389   : > { %2028 = vmatpush1.bf16.msra.mxu0 %v3765_v52  ;;  %v3845_v52 = vld [vmem:[%s5364_s7 + $0x1c4] ss:$16 sps:$4 sm:$0xff]  }
 0x38a   : > { %v4050_v53 = vpop.eup %4049 }
 0x38b   : > { %v1273_v55 = vsel %vm1260_vm3, %v4050_v53, 0.0 }
 0x38c   : > { %1274 = vadd.xlane.f32.xlu1 %v1273_v55  ;;  %v3773_v55 = vld [vmem:[%s5364_s7 + $0x44] ss:$16 sps:$4 sm:$0xff]  }
 0x38d   : > { %2029 = vmatprep.subr.bf16.mxu0 %v3773_v55  ;;  %v3843_v55 = vld [vmem:[%s5364_s7 + $0x1c0] ss:$16 sps:$4 sm:$0xff]  }
 0x392   : > { %v4052_v56 = vpop.eup %4051 }
 0x393   : > { %v1276_v57 = vsel %vm1260_vm3, %v4052_v56, 0.0 }
 0x394   : > { %1277 = vadd.xlane.f32.xlu1 %v1276_v57  ;;  %v3771_v57 = vld [vmem:[%s5364_s7 + $0x40] ss:$16 sps:$4 sm:$0xff]  }
 0x395   : > { %2030 = vmatpush1.bf16.msra.mxu0 %v3771_v57  ;;  %v3851_v57 = vld [vmem:[%s5364_s7 + $0x1e4] ss:$16 sps:$4 sm:$0xff]  }
 0x419   : > { %v1275_v58 = vpop.xlane.xlu1 %1274 }
 0x41a   : > { %4053 = vrcp.f32 %v1275_v58  ;;  %v3774_v58 = vld [vmem:[%s5364_s7 + $0x48] ss:$16 sps:$4 sm:$0xff]  }
 0x421   : > { %v1278_v59 = vpop.xlane.xlu1 %1277 }
 0x422   : > { %4055 = vrcp.f32 %v1278_v59  ;;  %v3779_v59 = vld [vmem:[%s5364_s7 + $0x64] ss:$16 sps:$4 sm:$0xff]  }
 0x423   : > { %2031 = vmatprep.subr.bf16.mxu0 %v3779_v59  ;;  %v3849_v59 = vld [vmem:[%s5364_s7 + $0x1e0] ss:$16 sps:$4 sm:$0xff]  }
 0x424   : > { %v4054_v60 = vpop.eup %4053 }
 0x425   : > { %v1281_v61 = vmul.f32 %v4054_v60, %v4050_v53  ;;  %v3768_v53 = vld [vmem:[%s5364_s7 + $0x28] ss:$16 sps:$4 sm:$0xff]   ;;  %v3782_v60 = vld [vmem:[%s5364_s7 + $0x6c] ss:$16 sps:$4 sm:$0xff]  }
 0x427   : > { %v1283_v62 = vpack.c.bf16 %v1281_v61, %v1281_v61  ;;  %v3777_v61 = vld [vmem:[%s5364_s7 + $0x60] ss:$16 sps:$4 sm:$0xff]  }
 0x428   : > { %2032 = vmatpush1.bf16.msra.mxu0 %v3777_v61  ;;  %v3857_v61 = vld [vmem:[%s5365_s8 + $0x4] ss:$16 sps:$4 sm:$0xff]  }
 0x429   : > { %3516 = vmatmul.mubr.msk.bf16.vlgmr.msra.gmra.mrb[4].mxu1 %vm1260_vm3, %v1283_v62  ;;  %v3780_v62 = vld [vmem:[%s5364_s7 + $0x68] ss:$16 sps:$4 sm:$0xff]  }
 0x42a   : > { %3520 = vmatpush3.bf16.msra.mxu1 %v4588_v11  ;;  %3521 = vmatprep.mubr.msk.bf16.mxu1 %vm4143_vm0, %v4141_v54  ;;  %v3719_v54 = vld [vmem:[%s5363_s6 + $0x24] ss:$8 sps:$4 sm:$0xff]   ;;  %v3720_v11 = vld [vmem:[%s5363_s6 + $0x30] ss:$8 sps:$4 sm:$0xff]  }
 0x42b   : > { %1572 = vmatprep.subr.bf16.mxu1 %v3713_v63  ;;  %v3785_v63 = vld [vmem:[%s5364_s7 + $0x84] ss:$16 sps:$4 sm:$0xff]  }
 0x42c   : > { %v4056_v0 = vpop.eup %4055  ;;  %2033 = vmatprep.subr.bf16.mxu0 %v3785_v63 }
 0x42d   : > { %v1282_v1 = vmul.f32 %v4056_v0, %v4052_v56  ;;  %v3776_v56 = vld [vmem:[%s5364_s7 + $0x4c] ss:$16 sps:$4 sm:$0xff]  }
 0x42e   : > { %v3788_v0 = vld [vmem:[%s5364_s7 + $0x8c] ss:$16 sps:$4 sm:$0xff]  }
 0x42f   : > { %v1284_v3 = vpack.c.bf16 %v1282_v1, %v1282_v1  ;;  %v3783_v1 = vld [vmem:[%s5364_s7 + $0x80] ss:$16 sps:$4 sm:$0xff]  }
 0x430   : > { %2034 = vmatpush1.bf16.msra.mxu0 %v3783_v1 }
 0x431   : > { %3522 = vmatmul.mubr.msk.bf16.vlgmr.msra.gmra.mrb[8].mxu1 %vm1260_vm3, %v1284_v3  ;;  %v3791_v3 = vld [vmem:[%s5364_s7 + $0xa4] ss:$16 sps:$4 sm:$0xff]  }
 0x432   : > { %1573 = vmatpush1.bf16.msra.mxu1 %v3711_v2  ;;  %v3786_v2 = vld [vmem:[%s5364_s7 + $0x88] ss:$16 sps:$4 sm:$0xff]   ;;  %2035 = vmatprep.subr.bf16.mxu0 %v3791_v3 }
 0x433   : > { %1574 = vmatprep.subr.bf16.mxu1 %v3716_v4  ;;  %v3794_v4 = vld [vmem:[%s5364_s7 + $0xac] ss:$16 sps:$4 sm:$0xff]  }
 0x436   : > { %1575 = vmatpush1.bf16.msra.mxu1 %v3714_v5  ;;  %v3789_v5 = vld [vmem:[%s5364_s7 + $0xa0] ss:$16 sps:$4 sm:$0xff]  }
 0x437   : > { %1576 = vmatprep.subr.bf16.mxu1 %v3719_v54  ;;  %v3792_v54 = vld [vmem:[%s5364_s7 + $0xa8] ss:$16 sps:$4 sm:$0xff]   ;;  %2036 = vmatpush1.bf16.msra.mxu0 %v3789_v5 }
 0x43a   : > { %1577 = vmatpush1.bf16.msra.mxu1 %v3717_v6  ;;  %v3797_v6 = vld [vmem:[%s5364_s7 + $0xc4] ss:$16 sps:$4 sm:$0xff]  }
 0x43b   : > { %1578 = vmatprep.subr.bf16.mxu1 %v3722_v7  ;;  %v3800_v7 = vld [vmem:[%s5364_s7 + $0xcc] ss:$16 sps:$4 sm:$0xff]   ;;  %2037 = vmatprep.subr.bf16.mxu0 %v3797_v6 }
 0x43e   : > { %1579 = vmatpush1.bf16.msra.mxu1 %v3720_v11  ;;  %v3795_v11 = vld [vmem:[%s5364_s7 + $0xc0] ss:$16 sps:$4 sm:$0xff]  }
 0x43f   : > { %1580 = vmatprep.subr.bf16.mxu1 %v3725_v15  ;;  %v3798_v15 = vld [vmem:[%s5364_s7 + $0xc8] ss:$16 sps:$4 sm:$0xff]   ;;  %2038 = vmatpush1.bf16.msra.mxu0 %v3795_v11 }
 0x442   : > { %1581 = vmatpush1.bf16.msra.mxu1 %v3723_v16  ;;  %v3803_v16 = vld [vmem:[%s5364_s7 + $0xe4] ss:$16 sps:$4 sm:$0xff]  }
 0x443   : > { %1582 = vmatprep.subr.bf16.mxu1 %v3728_v17  ;;  %v3806_v17 = vld [vmem:[%s5364_s7 + $0xec] ss:$16 sps:$4 sm:$0xff]   ;;  %2039 = vmatprep.subr.bf16.mxu0 %v3803_v16  ;;  %v3855_v16 = vld [vmem:[%s5365_s8] ss:$16 sps:$4 sm:$0xff]  }
 0x446   : > { %1583 = vmatpush1.bf16.msra.mxu1 %v3726_v18  ;;  %v3801_v18 = vld [vmem:[%s5364_s7 + $0xe0] ss:$16 sps:$4 sm:$0xff]  }
 0x447   : > { %1584 = vmatprep.subr.bf16.mxu1 %v3731_v19  ;;  %v3804_v19 = vld [vmem:[%s5364_s7 + $0xe8] ss:$16 sps:$4 sm:$0xff]   ;;  %2040 = vmatpush1.bf16.msra.mxu0 %v3801_v18  ;;  %v3861_v18 = vld [vmem:[%s5365_s8 + $0x20] ss:$16 sps:$4 sm:$0xff]  }
 0x44a   : > { %1585 = vmatpush1.bf16.msra.mxu1 %v3729_v20  ;;  %v3809_v20 = vld [vmem:[%s5364_s7 + $0x104] ss:$16 sps:$4 sm:$0xff]  }
 0x44b   : > { %1586 = vmatprep.subr.bf16.mxu1 %v3734_v21  ;;  %v3812_v21 = vld [vmem:[%s5364_s7 + $0x10c] ss:$16 sps:$4 sm:$0xff]   ;;  %2041 = vmatprep.subr.bf16.mxu0 %v3809_v20  ;;  %v3869_v20 = vld [vmem:[%s5365_s8 + $0x44] ss:$16 sps:$4 sm:$0xff]  }
 0x44e   : > { %1587 = vmatpush1.bf16.msra.mxu1 %v3732_v22  ;;  %v3807_v22 = vld [vmem:[%s5364_s7 + $0x100] ss:$16 sps:$4 sm:$0xff]  }
 0x44f   : > { %1588 = vmatprep.subr.bf16.mxu1 %v3737_v23  ;;  %v3810_v23 = vld [vmem:[%s5364_s7 + $0x108] ss:$16 sps:$4 sm:$0xff]   ;;  %2042 = vmatpush1.bf16.msra.mxu0 %v3807_v22  ;;  %v3867_v22 = vld [vmem:[%s5365_s8 + $0x40] ss:$16 sps:$4 sm:$0xff]  }
 0x452   : > { %1589 = vmatpush1.bf16.msra.mxu1 %v3735_v24  ;;  %v3815_v24 = vld [vmem:[%s5364_s7 + $0x124] ss:$16 sps:$4 sm:$0xff]  }
 0x453   : > { %1590 = vmatprep.subr.bf16.mxu1 %v3740_v25  ;;  %v3818_v25 = vld [vmem:[%s5364_s7 + $0x12c] ss:$16 sps:$4 sm:$0xff]   ;;  %2043 = vmatprep.subr.bf16.mxu0 %v3815_v24  ;;  %v3875_v24 = vld [vmem:[%s5365_s8 + $0x64] ss:$16 sps:$4 sm:$0xff]  }
 0x456   : > { %1591 = vmatpush1.bf16.msra.mxu1 %v3738_v26  ;;  %v3813_v26 = vld [vmem:[%s5364_s7 + $0x120] ss:$16 sps:$4 sm:$0xff]  }
 0x457   : > { %1592 = vmatprep.subr.bf16.mxu1 %v3743_v8  ;;  %v3816_v8 = vld [vmem:[%s5364_s7 + $0x128] ss:$16 sps:$4 sm:$0xff]   ;;  %2044 = vmatpush1.bf16.msra.mxu0 %v3813_v26  ;;  %v3873_v26 = vld [vmem:[%s5365_s8 + $0x60] ss:$16 sps:$4 sm:$0xff]  }
 0x45a   : > { %1593 = vmatpush1.bf16.msra.mxu1 %v3741_v9  ;;  %v3821_v9 = vld [vmem:[%s5364_s7 + $0x144] ss:$16 sps:$4 sm:$0xff]  }
 0x45b   : > { %1594 = vmatprep.subr.bf16.mxu1 %v3746_v27  ;;  %v3824_v27 = vld [vmem:[%s5364_s7 + $0x14c] ss:$16 sps:$4 sm:$0xff]   ;;  %2045 = vmatprep.subr.bf16.mxu0 %v3821_v9  ;;  %v3881_v9 = vld [vmem:[%s5365_s8 + $0x84] ss:$16 sps:$4 sm:$0xff]  }
 0x45e   : > { %1595 = vmatpush1.bf16.msra.mxu1 %v3744_v28  ;;  %v3819_v28 = vld [vmem:[%s5364_s7 + $0x140] ss:$16 sps:$4 sm:$0xff]  }
 0x45f   : > { %1596 = vmatprep.subr.bf16.mxu1 %v3749_v29  ;;  %v3822_v29 = vld [vmem:[%s5364_s7 + $0x148] ss:$16 sps:$4 sm:$0xff]   ;;  %2046 = vmatpush1.bf16.msra.mxu0 %v3819_v28  ;;  %v3879_v28 = vld [vmem:[%s5365_s8 + $0x80] ss:$16 sps:$4 sm:$0xff]  }
 0x462   : > { %1597 = vmatpush1.bf16.msra.mxu1 %v3747_v30 }
 0x463   : > { %1598 = vmatprep.subr.bf16.mxu1 %v3752_v31  ;;  %v4075_v31 = vld [vmem:[%s4284_s28] sm:$0xff] }
 0x466   : > { %1599 = vmatpush1.bf16.msra.mxu1 %v3750_v32 }
 0x467   : > { %1600 = vmatprep.subr.bf16.mxu1 %v3755_v34  ;;  %v4076_v34 = vld [vmem:[%s4284_s28 + $0x8] sm:$0xff] }
 0x46a   : > { %1601 = vmatpush1.bf16.msra.mxu1 %v3753_v33 }
 0x46b   : > { %1602 = vmatprep.subr.bf16.mxu1 %v3758_v35 }
 0x46e   : > { %1603 = vmatpush1.bf16.msra.mxu1 %v3756_v36 }
 0x46f   : > { %2066 = vmatprep.subr.bf16.mxu1 %v3764_v49  ;;  %v3842_v49 = vld [vmem:[%s5364_s7 + $0x1ac] ss:$16 sps:$4 sm:$0xff]  }
 0x4fc   : > { %v1326_v37 = vpop.f32.mrb[4].mxu1 }
 0x4fd   : > { %v3517_v38 = vpop.f32.mrb[5].mxu1  ;;  %v1378_v44 = vpack.c.bf16 %v1326_v37, %v1326_v37 }
 0x4fe   : > { %v1329_v39 = vpop.f32.mrb[6].mxu1 }
 0x4ff   : > { %v3518_v40 = vpop.f32.mrb[7].mxu1 }
 0x504   : > { %v1372_v41 = vpop.f32.mrb[8].mxu1 }
 0x505   : > { %v1379_v42 = vpack.c.bf16 %v1372_v41, %v1372_v41  ;;  %v3523_v43 = vpop.f32.mrb[9].mxu1  ;;  %v3827_v41 = vld [vmem:[%s5364_s7 + $0x164] ss:$16 sps:$4 sm:$0xff]  }
 0x506   : > { %v1375_v45 = vpop.f32.mrb[10].mxu1  ;;  %v3825_v43 = vld [vmem:[%s5364_s7 + $0x160] ss:$16 sps:$4 sm:$0xff]   ;;  %2047 = vmatprep.subr.bf16.mxu0 %v3827_v41  ;;  %v3902_v41 = vld [vmem:[%s5365_s8 + $0xec] ss:$16 sps:$4 sm:$0xff]  }
 0x507   : > { %v3524_v46 = vpop.f32.mrb[11].mxu1  ;;  %1604 = vmatprep.mubr.bf16.mxu1 %v1379_v42  ;;  %v3830_v42 = vld [vmem:[%s5364_s7 + $0x16c] ss:$16 sps:$4 sm:$0xff]   ;;  %2048 = vmatpush1.bf16.msra.mxu0 %v3825_v43  ;;  %v3831_v45 = vld [vmem:[%s5364_s7 + $0x180] ss:$16 sps:$4 sm:$0xff]  }
 0x508   : > { %1605 = vmatmul.mubr.bf16.vlgmr.msra.gmra.mrb[12].mxu1 %v1378_v44  ;;  %v3828_v44 = vld [vmem:[%s5364_s7 + $0x168] ss:$16 sps:$4 sm:$0xff]   ;;  %v3833_v46 = vld [vmem:[%s5364_s7 + $0x184] ss:$16 sps:$4 sm:$0xff]  }
 0x509   : > { %2067 = vmatpush1.bf16.msra.mxu1 %v3762_v48  ;;  %v3839_v48 = vld [vmem:[%s5364_s7 + $0x1a4] ss:$16 sps:$4 sm:$0xff]   ;;  %2049 = vmatprep.subr.bf16.mxu0 %v3833_v46  ;;  %v3900_v43 = vld [vmem:[%s5365_s8 + $0xe8] ss:$16 sps:$4 sm:$0xff]   ;;  %v3903_v46 = vld [vmem:[%s5365_s8 + $0x100] ss:$16 sps:$4 sm:$0xff]  }
 0x50a   : > { %2068 = vmatprep.subr.bf16.mxu1 %v3770_v51  ;;  %v3840_v51 = vld [vmem:[%s5364_s7 + $0x1a8] ss:$16 sps:$4 sm:$0xff]  }
 0x50b   : > { %2050 = vmatpush1.bf16.msra.mxu0 %v3831_v45  ;;  %v3908_v45 = vld [vmem:[%s5365_s8 + $0x10c] ss:$16 sps:$4 sm:$0xff]  }
 0x50c   : > { %2051 = vmatprep.subr.bf16.mxu0 %v3839_v48  ;;  %v3914_v48 = vld [vmem:[%s5365_s8 + $0x12c] ss:$16 sps:$4 sm:$0xff]  }
 0x50d   : > { %2069 = vmatpush1.bf16.msra.mxu1 %v3768_v53  ;;  %v3848_v53 = vld [vmem:[%s5364_s7 + $0x1cc] ss:$16 sps:$4 sm:$0xff]  }
 0x50e   : > { %2070 = vmatprep.subr.bf16.mxu1 %v3776_v56  ;;  %v3846_v56 = vld [vmem:[%s5364_s7 + $0x1c8] ss:$16 sps:$4 sm:$0xff]  }
 0x50f   : > { %2052 = vmatpush1.bf16.msra.mxu0 %v3837_v50  ;;  %v3912_v50 = vld [vmem:[%s5365_s8 + $0x128] ss:$16 sps:$4 sm:$0xff]  }
 0x510   : > { %2053 = vmatprep.subr.bf16.mxu0 %v3845_v52  ;;  %v3920_v52 = vld [vmem:[%s5365_s8 + $0x14c] ss:$16 sps:$4 sm:$0xff]  }
 0x511   : > { %2071 = vmatpush1.bf16.msra.mxu1 %v3774_v58  ;;  %v3854_v58 = vld [vmem:[%s5364_s7 + $0x1ec] ss:$16 sps:$4 sm:$0xff]  }
 0x512   : > { %2072 = vmatprep.subr.bf16.mxu1 %v3782_v60  ;;  %v3852_v60 = vld [vmem:[%s5364_s7 + $0x1e8] ss:$16 sps:$4 sm:$0xff]  }
 0x513   : > { %2054 = vmatpush1.bf16.msra.mxu0 %v3843_v55  ;;  %v3918_v55 = vld [vmem:[%s5365_s8 + $0x148] ss:$16 sps:$4 sm:$0xff]  }
 0x514   : > { %2055 = vmatprep.subr.bf16.mxu0 %v3851_v57  ;;  %v3926_v57 = vld [vmem:[%s5365_s8 + $0x16c] ss:$16 sps:$4 sm:$0xff]  }
 0x515   : > { %2073 = vmatpush1.bf16.msra.mxu1 %v3780_v62  ;;  %v3860_v62 = vld [vmem:[%s5365_s8 + $0xc] ss:$16 sps:$4 sm:$0xff]  }
 0x516   : > { %2074 = vmatprep.subr.bf16.mxu1 %v3788_v0 }
 0x517   : > { %2056 = vmatpush1.bf16.msra.mxu0 %v3849_v59  ;;  %v3924_v59 = vld [vmem:[%s5365_s8 + $0x168] ss:$16 sps:$4 sm:$0xff]  }
 0x518   : > { %2491 = vmatprep.subr.bf16.mxu0 %v3857_v61  ;;  %v3932_v61 = vld [vmem:[%s5365_s8 + $0x18c] ss:$16 sps:$4 sm:$0xff]  }
 0x519   : > { %2075 = vmatpush1.bf16.msra.mxu1 %v3786_v2  ;;  %v1621_v2 = vld [vmem:[%s5368_s11] sm:$0x3] }
 0x51a   : > { %2076 = vmatprep.subr.bf16.mxu1 %v3794_v4  ;;  %v1634_v3 = vrot.slane %v1621_v2, %v434_v13  ;;  %v1630_v4 = vrot.slane %v1621_v2, %v430_v14  ;;  %v3866_v14 = vld [vmem:[%s5365_s8 + $0x2c] ss:$16 sps:$4 sm:$0xff]   ;;  %v3933_v2 = vld [vmem:[%s5365_s8 + $0x1a0] ss:$16 sps:$4 sm:$0xff]  }
 0x51d   : > { %2077 = vmatpush1.bf16.msra.mxu1 %v3792_v54 }
 0x51e   : > { %2078 = vmatprep.subr.bf16.mxu1 %v3800_v7 }
 0x521   : > { %2079 = vmatpush1.bf16.msra.mxu1 %v3798_v15 }
 0x522   : > { %2080 = vmatprep.subr.bf16.mxu1 %v3806_v17  ;;  %v3858_v17 = vld [vmem:[%s5365_s8 + $0x8] ss:$16 sps:$4 sm:$0xff]  }
 0x525   : > { %2081 = vmatpush1.bf16.msra.mxu1 %v3804_v19  ;;  %v3864_v19 = vld [vmem:[%s5365_s8 + $0x28] ss:$16 sps:$4 sm:$0xff]  }
 0x526   : > { %2082 = vmatprep.subr.bf16.mxu1 %v3812_v21  ;;  %v3872_v21 = vld [vmem:[%s5365_s8 + $0x4c] ss:$16 sps:$4 sm:$0xff]  }
 0x529   : > { %2083 = vmatpush1.bf16.msra.mxu1 %v3810_v23  ;;  %v3870_v23 = vld [vmem:[%s5365_s8 + $0x48] ss:$16 sps:$4 sm:$0xff]  }
 0x52a   : > { %2084 = vmatprep.subr.bf16.mxu1 %v3818_v25  ;;  %v3878_v25 = vld [vmem:[%s5365_s8 + $0x6c] ss:$16 sps:$4 sm:$0xff]  }
 0x52d   : > { %2085 = vmatpush1.bf16.msra.mxu1 %v3816_v8  ;;  %v3876_v8 = vld [vmem:[%s5365_s8 + $0x68] ss:$16 sps:$4 sm:$0xff]  }
 0x52e   : > { %2086 = vmatprep.subr.bf16.mxu1 %v3824_v27  ;;  %v3884_v27 = vld [vmem:[%s5365_s8 + $0x8c] ss:$16 sps:$4 sm:$0xff]  }
 0x531   : > { %2087 = vmatpush1.bf16.msra.mxu1 %v3822_v29  ;;  %v3882_v29 = vld [vmem:[%s5365_s8 + $0x88] ss:$16 sps:$4 sm:$0xff]  }
 0x532   : > { %2088 = vmatprep.subr.bf16.mxu1 %v3830_v42  ;;  %v3897_v42 = vld [vmem:[%s5365_s8 + $0xe0] ss:$16 sps:$4 sm:$0xff]  }
 0x535   : > { %2089 = vmatpush1.bf16.msra.mxu1 %v3828_v44  ;;  %v3905_v44 = vld [vmem:[%s5365_s8 + $0x104] ss:$16 sps:$4 sm:$0xff]  }
 0x536   : > { %2090 = vmatprep.subr.bf16.mxu1 %v3836_v10  ;;  %v3911_v10 = vld [vmem:[%s5365_s8 + $0x124] ss:$16 sps:$4 sm:$0xff]  }
 0x539   : > { %2091 = vmatpush1.bf16.msra.mxu1 %v3834_v47  ;;  %v3906_v47 = vld [vmem:[%s5365_s8 + $0x108] ss:$16 sps:$4 sm:$0xff]  }
 0x53a   : > { %2092 = vmatprep.subr.bf16.mxu1 %v3842_v49  ;;  %v3909_v49 = vld [vmem:[%s5365_s8 + $0x120] ss:$16 sps:$4 sm:$0xff]  }
 0x53d   : > { %2093 = vmatpush1.bf16.msra.mxu1 %v3840_v51  ;;  %v3917_v51 = vld [vmem:[%s5365_s8 + $0x144] ss:$16 sps:$4 sm:$0xff]  }
 0x53e   : > { %2094 = vmatprep.subr.bf16.mxu1 %v3848_v53  ;;  %v3915_v53 = vld [vmem:[%s5365_s8 + $0x140] ss:$16 sps:$4 sm:$0xff]  }
 0x541   : > { %2095 = vmatpush1.bf16.msra.mxu1 %v3846_v56  ;;  %v3923_v56 = vld [vmem:[%s5365_s8 + $0x164] ss:$16 sps:$4 sm:$0xff]  }
 0x542   : > { %2096 = vmatprep.subr.bf16.mxu1 %v3854_v58  ;;  %v3921_v58 = vld [vmem:[%s5365_s8 + $0x160] ss:$16 sps:$4 sm:$0xff]  }
 0x545   : > { %2097 = vmatpush1.bf16.msra.mxu1 %v3852_v60  ;;  %v3929_v60 = vld [vmem:[%s5365_s8 + $0x184] ss:$16 sps:$4 sm:$0xff]  }
 0x546   : > { %2532 = vmatprep.subr.bf16.mxu1 %v3860_v62  ;;  %v3927_v62 = vld [vmem:[%s5365_s8 + $0x180] ss:$16 sps:$4 sm:$0xff]  }
 0x5db   : > { %v1606_v30 = vpop.f32.mrb[12].mxu1 }
 0x5dc   : > { %v4840_v32 = vadd.f32 %v4075_v31, %v1606_v30  ;;  %v1608_v33 = vpop.f32.mrb[13].mxu1  ;;  %v3887_v30 = vld [vmem:[%s5365_s8 + $0xa4] ss:$16 sps:$4 sm:$0xff]   ;;  %v3890_v31 = vld [vmem:[%s5365_s8 + $0xac] ss:$16 sps:$4 sm:$0xff]  }
 0x5dd   : > { %v4843_v35 = vadd.f32 %v4076_v34, %v1608_v33  ;;  %v1610_v36 = vpop.f32.mrb[14].mxu1  ;;  %v3885_v33 = vld [vmem:[%s5365_s8 + $0xa0] ss:$16 sps:$4 sm:$0xff]   ;;  %v3888_v34 = vld [vmem:[%s5365_s8 + $0xa8] ss:$16 sps:$4 sm:$0xff]  }
 0x5de   : > { %v1611_v37 = vpop.f32.mrb[15].mxu1  ;;  %v1615_v38 = vmul.f32 %v4840_v32, %v4840_v32  ;;  %v3893_v36 = vld [vmem:[%s5365_s8 + $0xc4] ss:$16 sps:$4 sm:$0xff]  }
 0x5df   : > { %v1616_v39 = vmul.f32 %v4843_v35, %v4843_v35  ;;  %v3896_v37 = vld [vmem:[%s5365_s8 + $0xcc] ss:$16 sps:$4 sm:$0xff]  }
 0x5e1   : > { %v1617_v40 = vadd.f32 %v1616_v39, %v1615_v38  ;;  %v3891_v38 = vld [vmem:[%s5365_s8 + $0xc0] ss:$16 sps:$4 sm:$0xff]   ;;  %v3894_v39 = vld [vmem:[%s5365_s8 + $0xc8] ss:$16 sps:$4 sm:$0xff]  }
 0x5e3   : > { %1618 = vadd.xlane.f32.xlu1 %v1617_v40  ;;  %v3899_v40 = vld [vmem:[%s5365_s8 + $0xe4] ss:$16 sps:$4 sm:$0xff]  }
 0x670   : > { %v1619_v63 = vpop.xlane.xlu1 %1618 }
 0x671   : > { %v1620_v0 = vmul.f32 0.00390625, %v1619_v63  ;;  %v3930_v63 = vld [vmem:[%s5365_s8 + $0x188] ss:$16 sps:$4 sm:$0xff]  }
 0x673   : > { %v1622_v1 = vadd.f32 1e-06, %v1620_v0  ;;  %v3935_v0 = vld [vmem:[%s5365_s8 + $0x1a4] ss:$16 sps:$4 sm:$0xff]  }
 0x675   : > { %4057 = vrsqrt.f32 %v1622_v1  ;;  %v3938_v1 = vld [vmem:[%s5365_s8 + $0x1ac] ss:$16 sps:$4 sm:$0xff]  }
 0x67f   : > { %v4058_v5 = vpop.eup %4057 }
 0x680   : > { %v1625_v54 = vmul.f32 %v4058_v5, %v4843_v35  ;;  %v1624_v6 = vmul.f32 %v4058_v5, %v4840_v32  ;;  %v3944_v5 = vld [vmem:[%s5365_s8 + $0x1cc] ss:$16 sps:$4 sm:$0xff]  }
 0x682   : > { %v1638_v7 = vmul.f32 %v1634_v3, %v1625_v54  ;;  %v1637_v11 = vmul.f32 %v1630_v4, %v1624_v6  ;;  %v3936_v3 = vld [vmem:[%s5365_s8 + $0x1a8] ss:$16 sps:$4 sm:$0xff]   ;;  %v3941_v4 = vld [vmem:[%s5365_s8 + $0x1c4] ss:$16 sps:$4 sm:$0xff]   ;;  %v3939_v54 = vld [vmem:[%s5365_s8 + $0x1c0] ss:$16 sps:$4 sm:$0xff]  }
 0x683   : > { %v3942_v6 = vld [vmem:[%s5365_s8 + $0x1c8] ss:$16 sps:$4 sm:$0xff]  }
 0x684   : > { %v1640_v15 = vpack.c.bf16 %v1638_v7, %v1638_v7  ;;  %v4930_v13 = vpack.c.bf16 %v1637_v11, %v1637_v11  ;;  %v3947_v7 = vld [vmem:[%s5365_s8 + $0x1e4] ss:$16 sps:$4 sm:$0xff]   ;;  %v3950_v11 = vld [vmem:[%s5365_s8 + $0x1ec] ss:$16 sps:$4 sm:$0xff]  }
 0x686   : > { %2057 = vmatprep.mubr.bf16.mxu0 %v1640_v15  ;;  %2098 = vmatprep.mubr.bf16.mxu1 %v1640_v15 }
 0x687   : > { %2058 = vmatmul.mubr.bf16.vlgmr.msra.gmra.mrb[16].mxu0 %v4930_v13  ;;  %2099 = vmatmul.mubr.bf16.vlgmr.msra.gmra.mrb[16].mxu1 %v4930_v13 }
 0x688   : > { %2492 = vmatpush1.bf16.msra.mxu0 %v3855_v16  ;;  %2533 = vmatpush1.bf16.msra.mxu1 %v3858_v17  ;;  %v3948_v16 = vld [vmem:[%s5365_s8 + $0x1e8] ss:$16 sps:$4 sm:$0xff]   ;;  %v3953_v17 = vld [vmem:[%s5366_s9 + $0x4] ss:$8 sps:$4 sm:$0xff]  }
 0x689   : > { %2523 = vmatprep.mubr.bf16.mxu0 %v1640_v15  ;;  %2564 = vmatprep.mubr.bf16.mxu1 %v1640_v15  ;;  %v3945_v15 = vld [vmem:[%s5365_s8 + $0x1e0] ss:$16 sps:$4 sm:$0xff]  }
 0x68a   : > { %2493 = vmatprep.subr.bf16.mxu0 %v3863_v12  ;;  %2534 = vmatprep.subr.bf16.mxu1 %v3866_v14  ;;  %v3956_v12 = vld [vmem:[%s5366_s9 + $0x104] ss:$8 sps:$4 sm:$0xff]   ;;  %v3951_v14 = vld [vmem:[%s5366_s9] ss:$8 sps:$4 sm:$0xff]  }
 0x68c   : > { %2494 = vmatpush1.bf16.msra.mxu0 %v3861_v18  ;;  %2535 = vmatpush1.bf16.msra.mxu1 %v3864_v19  ;;  %v3954_v18 = vld [vmem:[%s5366_s9 + $0x100] ss:$8 sps:$4 sm:$0xff]   ;;  %v3962_v19 = vld [vmem:[%s5366_s9 + $0x114] ss:$8 sps:$4 sm:$0xff]  }
 0x68d   : > { %2495 = vmatprep.subr.bf16.mxu0 %v3869_v20  ;;  %2536 = vmatprep.subr.bf16.mxu1 %v3872_v21  ;;  %v3957_v20 = vld [vmem:[%s5366_s9 + $0x10] ss:$8 sps:$4 sm:$0xff]  }
 0x68e   : > { %v3960_v21 = vld [vmem:[%s5366_s9 + $0x110] ss:$8 sps:$4 sm:$0xff]  }
 0x690   : > { %2496 = vmatpush1.bf16.msra.mxu0 %v3867_v22  ;;  %2537 = vmatpush1.bf16.msra.mxu1 %v3870_v23  ;;  %v3965_v22 = vld [vmem:[%s5366_s9 + $0x24] ss:$8 sps:$4 sm:$0xff]  }
 0x691   : > { %2497 = vmatprep.subr.bf16.mxu0 %v3875_v24  ;;  %2538 = vmatprep.subr.bf16.mxu1 %v3878_v25  ;;  %v3968_v23 = vld [vmem:[%s5366_s9 + $0x124] ss:$8 sps:$4 sm:$0xff]   ;;  %v3963_v24 = vld [vmem:[%s5366_s9 + $0x20] ss:$8 sps:$4 sm:$0xff]  }
 0x692   : > { %v3966_v25 = vld [vmem:[%s5366_s9 + $0x120] ss:$8 sps:$4 sm:$0xff]  }
 0x694   : > { %2498 = vmatpush1.bf16.msra.mxu0 %v3873_v26  ;;  %2539 = vmatpush1.bf16.msra.mxu1 %v3876_v8  ;;  %v3971_v26 = vld [vmem:[%s5366_s9 + $0x34] ss:$8 sps:$4 sm:$0xff]  }
 0x695   : > { %2499 = vmatprep.subr.bf16.mxu0 %v3881_v9  ;;  %2540 = vmatprep.subr.bf16.mxu1 %v3884_v27  ;;  %v3974_v8 = vld [vmem:[%s5366_s9 + $0x134] ss:$8 sps:$4 sm:$0xff]   ;;  %v3969_v9 = vld [vmem:[%s5366_s9 + $0x30] ss:$8 sps:$4 sm:$0xff]  }
 0x696   : > { %v3972_v27 = vld [vmem:[%s5366_s9 + $0x130] ss:$8 sps:$4 sm:$0xff]  }
 0x698   : > { %2500 = vmatpush1.bf16.msra.mxu0 %v3879_v28  ;;  %2541 = vmatpush1.bf16.msra.mxu1 %v3882_v29  ;;  %v3977_v28 = vld [vmem:[%s5366_s9 + $0x44] ss:$8 sps:$4 sm:$0xff]  }
 0x699   : > { %2501 = vmatprep.subr.bf16.mxu0 %v3887_v30  ;;  %2542 = vmatprep.subr.bf16.mxu1 %v3890_v31  ;;  %v3980_v29 = vld [vmem:[%s5366_s9 + $0x144] ss:$8 sps:$4 sm:$0xff]   ;;  %v3975_v30 = vld [vmem:[%s5366_s9 + $0x40] ss:$8 sps:$4 sm:$0xff]  }
 0x69a   : > { %v3978_v31 = vld [vmem:[%s5366_s9 + $0x140] ss:$8 sps:$4 sm:$0xff]  }
 0x69c   : > { %2502 = vmatpush1.bf16.msra.mxu0 %v3885_v33  ;;  %2543 = vmatpush1.bf16.msra.mxu1 %v3888_v34  ;;  %v3983_v33 = vld [vmem:[%s5366_s9 + $0x54] ss:$8 sps:$4 sm:$0xff]  }
 0x69d   : > { %2503 = vmatprep.subr.bf16.mxu0 %v3893_v36  ;;  %2544 = vmatprep.subr.bf16.mxu1 %v3896_v37  ;;  %v3986_v34 = vld [vmem:[%s5366_s9 + $0x154] ss:$8 sps:$4 sm:$0xff]   ;;  %v3981_v36 = vld [vmem:[%s5366_s9 + $0x50] ss:$8 sps:$4 sm:$0xff]  }
 0x69e   : > { %v3984_v37 = vld [vmem:[%s5366_s9 + $0x150] ss:$8 sps:$4 sm:$0xff]  }
 0x6a0   : > { %2504 = vmatpush1.bf16.msra.mxu0 %v3891_v38  ;;  %2545 = vmatpush1.bf16.msra.mxu1 %v3894_v39  ;;  %v3987_v38 = vld [vmem:[%s5366_s9 + $0x60] ss:$8 sps:$4 sm:$0xff]   ;;  %v3989_v39 = vld [vmem:[%s5366_s9 + $0x64] ss:$8 sps:$4 sm:$0xff]  }
 0x6a1   : > { %2505 = vmatprep.subr.bf16.mxu0 %v3899_v40  ;;  %2546 = vmatprep.subr.bf16.mxu1 %v3902_v41  ;;  %v3990_v40 = vld [vmem:[%s5366_s9 + $0x160] ss:$8 sps:$4 sm:$0xff]   ;;  %v3992_v41 = vld [vmem:[%s5366_s9 + $0x164] ss:$8 sps:$4 sm:$0xff]  }
 0x6a4   : > { %2506 = vmatpush1.bf16.msra.mxu0 %v3897_v42  ;;  %2547 = vmatpush1.bf16.msra.mxu1 %v3900_v43  ;;  %v3995_v42 = vld [vmem:[%s5366_s9 + $0x74] ss:$8 sps:$4 sm:$0xff]  }
 0x6a5   : > { %2507 = vmatprep.subr.bf16.mxu0 %v3905_v44  ;;  %2548 = vmatprep.subr.bf16.mxu1 %v3908_v45  ;;  %v3998_v43 = vld [vmem:[%s5366_s9 + $0x174] ss:$8 sps:$4 sm:$0xff]   ;;  %v3993_v44 = vld [vmem:[%s5366_s9 + $0x70] ss:$8 sps:$4 sm:$0xff]  }
 0x6a6   : > { %v3996_v45 = vld [vmem:[%s5366_s9 + $0x170] ss:$8 sps:$4 sm:$0xff]  }
 0x6a8   : > { %2508 = vmatpush1.bf16.msra.mxu0 %v3903_v46  ;;  %2549 = vmatpush1.bf16.msra.mxu1 %v3906_v47  ;;  %v4001_v46 = vld [vmem:[%s5366_s9 + $0x84] ss:$8 sps:$4 sm:$0xff]  }
 0x6a9   : > { %2509 = vmatprep.subr.bf16.mxu0 %v3911_v10  ;;  %2550 = vmatprep.subr.bf16.mxu1 %v3914_v48  ;;  %v4004_v47 = vld [vmem:[%s5366_s9 + $0x184] ss:$8 sps:$4 sm:$0xff]   ;;  %v3999_v10 = vld [vmem:[%s5366_s9 + $0x80] ss:$8 sps:$4 sm:$0xff]  }
 0x6aa   : > { %v4002_v48 = vld [vmem:[%s5366_s9 + $0x180] ss:$8 sps:$4 sm:$0xff]  }
 0x6ac   : > { %2510 = vmatpush1.bf16.msra.mxu0 %v3909_v49  ;;  %2551 = vmatpush1.bf16.msra.mxu1 %v3912_v50  ;;  %v4007_v49 = vld [vmem:[%s5366_s9 + $0x94] ss:$8 sps:$4 sm:$0xff]  }
 0x6ad   : > { %2511 = vmatprep.subr.bf16.mxu0 %v3917_v51  ;;  %2552 = vmatprep.subr.bf16.mxu1 %v3920_v52  ;;  %v4010_v50 = vld [vmem:[%s5366_s9 + $0x194] ss:$8 sps:$4 sm:$0xff]   ;;  %v4005_v51 = vld [vmem:[%s5366_s9 + $0x90] ss:$8 sps:$4 sm:$0xff]  }
 0x6ae   : > { %v4008_v52 = vld [vmem:[%s5366_s9 + $0x190] ss:$8 sps:$4 sm:$0xff]  }
 0x6b0   : > { %2512 = vmatpush1.bf16.msra.mxu0 %v3915_v53  ;;  %2553 = vmatpush1.bf16.msra.mxu1 %v3918_v55  ;;  %v4013_v53 = vld [vmem:[%s5366_s9 + $0xa4] ss:$8 sps:$4 sm:$0xff]  }
 0x6b1   : > { %2513 = vmatprep.subr.bf16.mxu0 %v3923_v56  ;;  %2554 = vmatprep.subr.bf16.mxu1 %v3926_v57  ;;  %v4016_v55 = vld [vmem:[%s5366_s9 + $0x1a4] ss:$8 sps:$4 sm:$0xff]   ;;  %v4011_v56 = vld [vmem:[%s5366_s9 + $0xa0] ss:$8 sps:$4 sm:$0xff]  }
 0x6b2   : > { %v4014_v57 = vld [vmem:[%s5366_s9 + $0x1a0] ss:$8 sps:$4 sm:$0xff]  }
 0x6b4   : > { %2514 = vmatpush1.bf16.msra.mxu0 %v3921_v58  ;;  %2555 = vmatpush1.bf16.msra.mxu1 %v3924_v59  ;;  %v4019_v58 = vld [vmem:[%s5366_s9 + $0xb4] ss:$8 sps:$4 sm:$0xff]  }
 0x6b5   : > { %2515 = vmatprep.subr.bf16.mxu0 %v3929_v60  ;;  %2556 = vmatprep.subr.bf16.mxu1 %v3932_v61  ;;  %v4022_v59 = vld [vmem:[%s5366_s9 + $0x1b4] ss:$8 sps:$4 sm:$0xff]   ;;  %v4017_v60 = vld [vmem:[%s5366_s9 + $0xb0] ss:$8 sps:$4 sm:$0xff]  }
 0x6b6   : > { %v4020_v61 = vld [vmem:[%s5366_s9 + $0x1b0] ss:$8 sps:$4 sm:$0xff]  }
 0x6b8   : > { %2516 = vmatpush1.bf16.msra.mxu0 %v3927_v62  ;;  %2557 = vmatpush1.bf16.msra.mxu1 %v3930_v63  ;;  %v4025_v62 = vld [vmem:[%s5366_s9 + $0xc4] ss:$8 sps:$4 sm:$0xff]  }
 0x6b9   : > { %2517 = vmatprep.subr.bf16.mxu0 %v3935_v0  ;;  %2558 = vmatprep.subr.bf16.mxu1 %v3938_v1  ;;  %v4028_v63 = vld [vmem:[%s5366_s9 + $0x1c4] ss:$8 sps:$4 sm:$0xff]   ;;  %v4023_v0 = vld [vmem:[%s5366_s9 + $0xc0] ss:$8 sps:$4 sm:$0xff]  }
 0x6ba   : > { %v4026_v1 = vld [vmem:[%s5366_s9 + $0x1c0] ss:$8 sps:$4 sm:$0xff]  }
 0x6bc   : > { %2518 = vmatpush1.bf16.msra.mxu0 %v3933_v2  ;;  %2559 = vmatpush1.bf16.msra.mxu1 %v3936_v3  ;;  %v4031_v2 = vld [vmem:[%s5366_s9 + $0xd4] ss:$8 sps:$4 sm:$0xff]  }
 0x6bd   : > { %2519 = vmatprep.subr.bf16.mxu0 %v3941_v4  ;;  %2560 = vmatprep.subr.bf16.mxu1 %v3944_v5  ;;  %v4034_v3 = vld [vmem:[%s5366_s9 + $0x1d4] ss:$8 sps:$4 sm:$0xff]   ;;  %v4029_v4 = vld [vmem:[%s5366_s9 + $0xd0] ss:$8 sps:$4 sm:$0xff]  }
 0x6be   : > { %v4032_v5 = vld [vmem:[%s5366_s9 + $0x1d0] ss:$8 sps:$4 sm:$0xff]  }
 0x6c0   : > { %2520 = vmatpush1.bf16.msra.mxu0 %v3939_v54  ;;  %2561 = vmatpush1.bf16.msra.mxu1 %v3942_v6  ;;  %v4037_v54 = vld [vmem:[%s5366_s9 + $0xe4] ss:$8 sps:$4 sm:$0xff]  }
 0x6c1   : > { %2521 = vmatprep.subr.bf16.mxu0 %v3947_v7  ;;  %2562 = vmatprep.subr.bf16.mxu1 %v3950_v11  ;;  %v4040_v6 = vld [vmem:[%s5366_s9 + $0x1e4] ss:$8 sps:$4 sm:$0xff]   ;;  %v4035_v7 = vld [vmem:[%s5366_s9 + $0xe0] ss:$8 sps:$4 sm:$0xff]  }
 0x6c2   : > { %v4038_v11 = vld [vmem:[%s5366_s9 + $0x1e0] ss:$8 sps:$4 sm:$0xff]  }
 0x6c4   : > { %2522 = vmatpush1.bf16.msra.mxu0 %v3945_v15  ;;  %2563 = vmatpush1.bf16.msra.mxu1 %v3948_v16  ;;  %v4043_v15 = vld [vmem:[%s5366_s9 + $0xf4] ss:$8 sps:$4 sm:$0xff]  }
 0x6c5   : > { %2993 = vmatprep.subr.bf16.mxu0 %v3953_v17  ;;  %3034 = vmatprep.subr.bf16.mxu1 %v3956_v12  ;;  %v4046_v16 = vld [vmem:[%s5366_s9 + $0x1f4] ss:$8 sps:$4 sm:$0xff]   ;;  %v4041_v17 = vld [vmem:[%s5366_s9 + $0xf0] ss:$8 sps:$4 sm:$0xff]  }
 0x6c6   : > { %v4044_v12 = vld [vmem:[%s5366_s9 + $0x1f0] ss:$8 sps:$4 sm:$0xff]  }
 0x6c7   : > { %2524 = vmatmul.mubr.bf16.vlgmr.msra.gmra.mrb[20].mxu0 %v4930_v13  ;;  %2565 = vmatmul.mubr.bf16.vlgmr.msra.gmra.mrb[20].mxu1 %v4930_v13  ;;  %v3959_v13 = vld [vmem:[%s5366_s9 + $0x14] ss:$8 sps:$4 sm:$0xff]  }
 0x6c8   : > { %2994 = vmatpush1.bf16.msra.mxu0 %v3951_v14  ;;  %3035 = vmatpush1.bf16.msra.mxu1 %v3954_v18 }
 0x6c9   : > { %2995 = vmatprep.subr.bf16.mxu0 %v3959_v13  ;;  %3036 = vmatprep.subr.bf16.mxu1 %v3962_v19 }
 0x6cc   : > { %2996 = vmatpush1.bf16.msra.mxu0 %v3957_v20  ;;  %3037 = vmatpush1.bf16.msra.mxu1 %v3960_v21 }
 0x6cd   : > { %2997 = vmatprep.subr.bf16.mxu0 %v3965_v22  ;;  %3038 = vmatprep.subr.bf16.mxu1 %v3968_v23 }
 0x6d0   : > { %2998 = vmatpush1.bf16.msra.mxu0 %v3963_v24  ;;  %3039 = vmatpush1.bf16.msra.mxu1 %v3966_v25 }
 0x6d1   : > { %2999 = vmatprep.subr.bf16.mxu0 %v3971_v26  ;;  %3040 = vmatprep.subr.bf16.mxu1 %v3974_v8 }
 0x6d4   : > { %3000 = vmatpush1.bf16.msra.mxu0 %v3969_v9  ;;  %3041 = vmatpush1.bf16.msra.mxu1 %v3972_v27 }
 0x6d5   : > { %3001 = vmatprep.subr.bf16.mxu0 %v3977_v28  ;;  %3042 = vmatprep.subr.bf16.mxu1 %v3980_v29 }
 0x6d8   : > { %3002 = vmatpush1.bf16.msra.mxu0 %v3975_v30  ;;  %3043 = vmatpush1.bf16.msra.mxu1 %v3978_v31 }
 0x6d9   : > { %3003 = vmatprep.subr.bf16.mxu0 %v3983_v33  ;;  %3044 = vmatprep.subr.bf16.mxu1 %v3986_v34 }
 0x6dc   : > { %3004 = vmatpush1.bf16.msra.mxu0 %v3981_v36  ;;  %3045 = vmatpush1.bf16.msra.mxu1 %v3984_v37 }
 0x6dd   : > { %3005 = vmatprep.subr.bf16.mxu0 %v3989_v39  ;;  %3046 = vmatprep.subr.bf16.mxu1 %v3992_v41 }
 0x6e0   : > { %3006 = vmatpush1.bf16.msra.mxu0 %v3987_v38  ;;  %3047 = vmatpush1.bf16.msra.mxu1 %v3990_v40 }
 0x6e1   : > { %3007 = vmatprep.subr.bf16.mxu0 %v3995_v42  ;;  %3048 = vmatprep.subr.bf16.mxu1 %v3998_v43 }
 0x6e4   : > { %3008 = vmatpush1.bf16.msra.mxu0 %v3993_v44  ;;  %3049 = vmatpush1.bf16.msra.mxu1 %v3996_v45 }
 0x6e5   : > { %3009 = vmatprep.subr.bf16.mxu0 %v4001_v46  ;;  %3050 = vmatprep.subr.bf16.mxu1 %v4004_v47 }
 0x6e8   : > { %3010 = vmatpush1.bf16.msra.mxu0 %v3999_v10  ;;  %3051 = vmatpush1.bf16.msra.mxu1 %v4002_v48 }
 0x6e9   : > { %3011 = vmatprep.subr.bf16.mxu0 %v4007_v49  ;;  %3052 = vmatprep.subr.bf16.mxu1 %v4010_v50 }
 0x6ec   : > { %3012 = vmatpush1.bf16.msra.mxu0 %v4005_v51  ;;  %3053 = vmatpush1.bf16.msra.mxu1 %v4008_v52 }
 0x6ed   : > { %3013 = vmatprep.subr.bf16.mxu0 %v4013_v53  ;;  %3054 = vmatprep.subr.bf16.mxu1 %v4016_v55 }
 0x6f0   : > { %3014 = vmatpush1.bf16.msra.mxu0 %v4011_v56  ;;  %3055 = vmatpush1.bf16.msra.mxu1 %v4014_v57 }
 0x6f1   : > { %3015 = vmatprep.subr.bf16.mxu0 %v4019_v58  ;;  %3056 = vmatprep.subr.bf16.mxu1 %v4022_v59 }
 0x6f4   : > { %3016 = vmatpush1.bf16.msra.mxu0 %v4017_v60  ;;  %3057 = vmatpush1.bf16.msra.mxu1 %v4020_v61 }
 0x6f5   : > { %3017 = vmatprep.subr.bf16.mxu0 %v4025_v62  ;;  %3058 = vmatprep.subr.bf16.mxu1 %v4028_v63 }
 0x6f8   : > { %3018 = vmatpush1.bf16.msra.mxu0 %v4023_v0  ;;  %3059 = vmatpush1.bf16.msra.mxu1 %v4026_v1 }
 0x6f9   : > { %3019 = vmatprep.subr.bf16.mxu0 %v4031_v2  ;;  %3060 = vmatprep.subr.bf16.mxu1 %v4034_v3 }
 0x6fc   : > { %3020 = vmatpush1.bf16.msra.mxu0 %v4029_v4  ;;  %3061 = vmatpush1.bf16.msra.mxu1 %v4032_v5 }
 0x6fd   : > { %3021 = vmatprep.subr.bf16.mxu0 %v4037_v54  ;;  %3062 = vmatprep.subr.bf16.mxu1 %v4040_v6 }
 0x700   : > { %3022 = vmatpush1.bf16.msra.mxu0 %v4035_v7  ;;  %3063 = vmatpush1.bf16.msra.mxu1 %v4038_v11 }
 0x701   : > { %3023 = vmatprep.subr.bf16.mxu0 %v4043_v15  ;;  %3064 = vmatprep.subr.bf16.mxu1 %v4046_v16 }
 0x704   : > { %3024 = vmatpush1.bf16.msra.mxu0 %v4041_v17  ;;  %3065 = vmatpush1.bf16.msra.mxu1 %v4044_v12 }
 0x75a   : > { %v2059_v14 = vpop.f32.mrb[16].mxu0  ;;  %v2100_v18 = vpop.f32.mrb[16].mxu1 }
 0x75b   : > { %v2061_v13 = vpop.f32.mrb[17].mxu0  ;;  %v2102_v19 = vpop.f32.mrb[17].mxu1  ;;  %v3418_v24 = vmul.f32 -1.442695, %v2059_v14  ;;  %v3420_v25 = vmul.f32 -1.442695, %v2100_v18 }
 0x75c   : > { %v2063_v20 = vpop.f32.mrb[18].mxu0  ;;  %v2104_v21 = vpop.f32.mrb[18].mxu1  ;;  %v3419_v26 = vmul.f32 -1.442695, %v2061_v13  ;;  %v3421_v8 = vmul.f32 -1.442695, %v2102_v19 }
 0x75d   : > { %v2064_v22 = vpop.f32.mrb[19].mxu0  ;;  %v2105_v23 = vpop.f32.mrb[19].mxu1  ;;  %4059 = vpow2.f32 %v3418_v24 }
 0x75e   : > { %4061 = vpow2.f32 %v3420_v25 }
 0x75f   : > { %4063 = vpow2.f32 %v3419_v26 }
 0x760   : > { %4065 = vpow2.f32 %v3421_v8 }
 0x767   : > { %v4060_v9 = vpop.eup %4059 }
 0x768   : > { %v4062_v27 = vpop.eup %4061  ;;  %v2585_v30 = vadd.f32 1.0, %v4060_v9 }
 0x769   : > { %v4064_v28 = vpop.eup %4063  ;;  %v2587_v31 = vadd.f32 1.0, %v4062_v27 }
 0x76a   : > { %v4066_v29 = vpop.eup %4065  ;;  %v2586_v33 = vadd.f32 1.0, %v4064_v28  ;;  %4067 = vrcp.f32 %v2585_v30 }
 0x76b   : > { %v2588_v34 = vadd.f32 1.0, %v4066_v29  ;;  %4069 = vrcp.f32 %v2587_v31 }
 0x76c   : > { %4071 = vrcp.f32 %v2586_v33 }
 0x76d   : > { %4073 = vrcp.f32 %v2588_v34 }
 0x774   : > { %v4068_v36 = vpop.eup %4067 }
 0x775   : > { %v4070_v37 = vpop.eup %4069  ;;  %v2597_v40 = vmul.f32 %v4068_v36, %v2059_v14 }
 0x776   : > { %v4072_v38 = vpop.eup %4071  ;;  %v2599_v41 = vmul.f32 %v4070_v37, %v2100_v18 }
 0x777   : > { %v4074_v39 = vpop.eup %4073  ;;  %v2598_v42 = vmul.f32 %v4072_v38, %v2061_v13 }
 0x778   : > { %v2600_v43 = vmul.f32 %v4074_v39, %v2102_v19 }
 0x79a   : > { %v2525_v44 = vpop.f32.mrb[20].mxu0  ;;  %v2566_v45 = vpop.f32.mrb[20].mxu1 }
 0x79b   : > { %v2601_v46 = vmul.f32 %v2597_v40, %v2525_v44  ;;  %v2603_v47 = vmul.f32 %v2599_v41, %v2566_v45  ;;  %v2527_v10 = vpop.f32.mrb[21].mxu0  ;;  %v2568_v48 = vpop.f32.mrb[21].mxu1 }
 0x79c   : > { %v2602_v49 = vmul.f32 %v2598_v42, %v2527_v10  ;;  %v2604_v50 = vmul.f32 %v2600_v43, %v2568_v48  ;;  %v2529_v51 = vpop.f32.mrb[22].mxu0  ;;  %v2570_v52 = vpop.f32.mrb[22].mxu1 }
 0x79d   : > { %v2530_v53 = vpop.f32.mrb[23].mxu0  ;;  %v2571_v55 = vpop.f32.mrb[23].mxu1  ;;  %v2605_v58 = vpack.c.bf16 %v2601_v46, %v2601_v46  ;;  %v2607_v59 = vpack.c.bf16 %v2603_v47, %v2603_v47 }
 0x79e   : > { %v2606_v56 = vpack.c.bf16 %v2602_v49, %v2602_v49  ;;  %v2608_v57 = vpack.c.bf16 %v2604_v50, %v2604_v50 }
 0x7a0   : > { %3025 = vmatprep.mubr.bf16.mxu0 %v2606_v56  ;;  %3066 = vmatprep.mubr.bf16.mxu1 %v2608_v57 }
 0x7a1   : > { %3026 = vmatmul.mubr.bf16.vlgmr.msra.gmra.mrb[24].mxu0 %v2605_v58  ;;  %3067 = vmatmul.mubr.bf16.vlgmr.msra.gmra.mrb[24].mxu1 %v2607_v59 }
 0x874   : > { %v3027_v60 = vpop.f32.mrb[24].mxu0  ;;  %v3068_v61 = vpop.f32.mrb[24].mxu1 }
 0x875   : > { %v3069_v62 = vadd.f32 %v3068_v61, %v3027_v60  ;;  %v3029_v63 = vpop.f32.mrb[25].mxu0  ;;  %v3070_v0 = vpop.f32.mrb[25].mxu1 }
 0x876   : > { %v3071_v1 = vadd.f32 %v3070_v0, %v3029_v63  ;;  %v3031_v2 = vpop.f32.mrb[26].mxu0  ;;  %v3072_v3 = vpop.f32.mrb[26].mxu1 }
 0x877   : > { %v3075_v4 = vadd.f32 %v3069_v62, %v4840_v32  ;;  %v3032_v5 = vpop.f32.mrb[27].mxu0  ;;  %v3073_v54 = vpop.f32.mrb[27].mxu1 }
 0x878   : > { %v3076_v6 = vadd.f32 %v3071_v1, %v4843_v35 }
 0x879   : > { %3077 = vst [vmem:[%s406_s18] sm:$0xff] %v3075_v4 }
 0x87a   : > { %3078 = vst [vmem:[%s406_s18 + $0x8] sm:$0xff] %v3076_v6 }
 0x87b   : > { %4090 = shalt.err (!%p4087_p3)
}
 0x87c   : > { %s4091_s15 = scalar_lea.hbm %s5315_s23, 256  ;;  %s4095_s18 = scalar_lea.hbm %s5369_s12, 512 }
 0x87d   : > { %p4092_p4 = scmp.ne.s32.totalorder %s5315_s23, %s4091_s15  ;;  %p4096_p9 = scmp.lt.u32.totalorder %s5315_s23, %s5369_s12 }
 0x87e   : > { %p4097_p10 = scmp.lt.u32.totalorder %s4095_s18, %s4091_s15  ;;  %p4099_p12 = scmp.lt.u32.totalorder %s4091_s15, %s5315_s23 }
 0x87f   : > { %p4093_p7 = pnand %p4092_p4, %p4248_p5 }
 0x880   : > { %p4098_p11 = por %p4097_p10, %p4096_p9 }
 0x881   : > { %p4094_p8 = pneg %p4093_p7 }
 0x882   : > { %p4100_p13 = por %p4099_p12, %p4098_p11 }
 0x884   : > { %p4101_p0 = pnand %p4100_p13, %p4094_p8 }
 0x886   : > { %4104 = shalt.err (!%p4101_p0)
}
 0x887   : > { %3525 = dma.vmem_to_hbm [thread:$0]  (%p4248_p5), %s5317_s20, 256, %s5315_s23, %s3080_s25  }
 0x888 PF: > { %p3531_p1 = scmp.ge.s32.totalorder %s4139_s24, 2  ;;  %s3106_s30 = sand.u32 1, %s4127_s21  }
 0x889   : > { %s3107_s27 = scalar_lea.sflag [#allocation3], %s3106_s30 }
 0x88a   : > { %p3528_p2 = pnand %p3531_p1, %p4252_p6 }
 0x88c   : > { %4122 = dma.done.wait (!%p3528_p2), %s3107_s27, 256  }
 0x88d   : > { %4124 = vsyncadd (!%p3528_p2), %s3107_s27, 4294967040  ;;  %s5378_s24 = sld [smem:[#allocation6_spill]]  ;;  %s5379_s19 = sld [smem:[#allocation5_spill]] }
 0x88e   : > { %s5380_s23 = sld [smem:[#allocation7_spill]]  ;;  %s5381_s21 = smov %s4131_s22 }
 0x893   : > { %p22_p3 = scmp.ge.s32.totalorder %s5378_s24, 4   ;;  %s5382_s22 = smov %s5379_s19 }
 0x895   :  { %24 = sbr.rel (!%p22_p3) target bundleno = 3 (0x3), region = 103 }
 0x89c   :  { %3112 = vsyncpa [#allocation3], 1 }
 0x89d   :  { %3114 = vsyncpa [#allocation3 + $0x1], 1 }

</bundles_post_ra>
